<compile_context>
chip_gen: v7x
topology: tpu7x:2x2x1
jax: 0.10.0
libtpu: 0.0.40
codegen_flags: <defaults>
</compile_context>

<pallas_src>
import functools

import jax
import jax.numpy as jnp
from jax import lax
from jax.experimental import pallas as pl
from jax.experimental.pallas import tpu as pltpu

KSIZE = 4
STRIDE = 2
PAD = 1


def _upsample_kernel(x_ref, mt_ref, b_ref, o_ref, patch_ref, *, th, w, c):
    """One (batch, row-tile) step of the polyphase transposed conv.

    x_ref:     (H+2, W+2, C)   zero-padded NHWC input, one batch element (resident)
    mt_ref:    (2, 2C, 6C)     fused per-row-phase weights (pre-transposed)
    b_ref:     (2C, 1)         bias tiled over the two column phases
    o_ref:     (2, 2C, TH*W)   planar per-phase output tile (lane-dense minor dim)
    patch_ref: (TH*W, 6C)      VMEM im2col scratch
    """
    row0 = pl.program_id(1) * th
    for p in range(2):                           # output row phase (oh % 2)
        # ---- im2col: 2x3 padded-input window -> scratch patch (TH*W, 6C) ----
        for dr in range(2):                      # window row
            for dc in range(3):                  # window col (union of both col phases)
                k = dr * 3 + dc
                piece = x_ref[pl.ds(row0 + p + dr, th), dc:dc + w, :]   # (th, w, c)
                patch_ref[:, k * c:(k + 1) * c] = piece.reshape(th * w, c)
        # ---- one fat matmul per row phase: (2C,6C) . (TH*W,6C)^T -> (2C, TH*W) ----
        acc = lax.dot_general(
            mt_ref[p], patch_ref[...],
            dimension_numbers=(((1,), (1,)), ((), ())),
            preferred_element_type=jnp.float32)
        o_ref[p] = (acc + b_ref[...]).astype(o_ref.dtype)


def _pick_row_tile(h, w, c):
    """Largest TH dividing H with TH*W lane-aligned (%128) and a bounded im2col
    scratch/accumulator; prefers >=2 row tiles (pipelining / megacore)."""
    best = h
    for th in range(1, h):
        if h % th or (th * w) % 128:
            continue
        if th * w * c > 16384:
            continue
        best = th
    return best


@jax.jit
def upsample_conv_transpose(x_nchw, weight, bias):
    """PyTorch-equivalent ConvTranspose2d(C, C, 4, stride=2, padding=1).

    x_nchw: (B, C, H, W); weight: (C_in, C_out, 4, 4); bias: (C_out,)
    returns (B, C, 2H, 2W) in NCHW.
    """
    B, C, H, W = x_nchw.shape
    dtype = x_nchw.dtype
    th = _pick_row_tile(H, W, C)

    # ---- input glue: NCHW -> NHWC, pad by 1 (original-resolution input only) ----
    x_nhwc = jnp.transpose(x_nchw, (0, 2, 3, 1))
    xp = jnp.pad(x_nhwc, ((0, 0), (1, 1), (1, 1), (0, 0)))        # (B, H+2, W+2, C)

    # ---- fused polyphase weights: MT[p, q*C+co, (dr*3+dc)*C+ci] ----
    # row phase p uses taps kh = 3 - p - 2*dr (dr in {0,1});
    # col phase q uses padded cols j+dc with dc in {q, q+1}, kw = 3 + q - 2*dc.
    mt = jnp.zeros((2, 2 * C, 6 * C), dtype)
    for p in range(2):
        for dr in range(2):
            kh = 3 - p - 2 * dr
            for dc in range(3):
                for q in range(2):
                    if dc < q or dc > q + 1:
                        continue
                    kw = 3 + q - 2 * dc
                    blk = jnp.transpose(weight[:, :, kh, kw])      # (co, ci)
                    mt = mt.at[p, q * C:(q + 1) * C,
                               (dr * 3 + dc) * C:(dr * 3 + dc + 1) * C].set(blk)
    b_col = jnp.tile(bias, 2).reshape(2 * C, 1).astype(dtype)

    out_planar = pl.pallas_call(
        functools.partial(_upsample_kernel, th=th, w=W, c=C),
        out_shape=jax.ShapeDtypeStruct((B, 2, 2 * C, H * W), dtype),
        grid=(B, H // th),
        in_specs=[
            pl.BlockSpec((None, H + 2, W + 2, C), lambda b, i: (b, 0, 0, 0)),
            pl.BlockSpec((2, 2 * C, 6 * C), lambda b, i: (0, 0, 0)),
            pl.BlockSpec((2 * C, 1), lambda b, i: (0, 0)),
        ],
        out_specs=pl.BlockSpec((None, 2, 2 * C, th * W), lambda b, i: (b, 0, 0, i)),
        scratch_shapes=[pltpu.VMEM((th * W, 6 * C), dtype)],
        compiler_params=pltpu.CompilerParams(
            dimension_semantics=("parallel", "parallel"),
            vmem_limit_bytes=48 * 1024 * 1024),
    )(xp, mt, b_col)

    # ---- single output transpose back to NCHW (also interleaves the 4 phases) ----
    out6 = out_planar.reshape(B, 2, 2, C, H, W)                    # [b, p, q, co, i, j]
    y = jnp.transpose(out6, (0, 3, 4, 1, 5, 2)).reshape(B, C, STRIDE * H, STRIDE * W)
    return y


def _reference(x_nchw, weight, bias):
    # pure-JAX reference for ConvTranspose2d(4, stride=2, padding=1)
    w_conv = jnp.transpose(weight[:, :, ::-1, ::-1], (1, 0, 2, 3))  # (co, ci, kh, kw)
    y = lax.conv_general_dilated(
        x_nchw, w_conv, window_strides=(1, 1),
        padding=[(KSIZE - 1 - PAD, KSIZE - 1 - PAD)] * 2,
        lhs_dilation=(STRIDE, STRIDE),
        dimension_numbers=("NCHW", "OIHW", "NCHW"))
    return y + bias.reshape(1, -1, 1, 1)


if __name__ == "__main__":
    key = jax.random.PRNGKey(0)
    kx, kw_, kb = jax.random.split(key, 3)
    B, C, H, W = 2, 4, 16, 16
    x = jax.random.normal(kx, (B, C, H, W), jnp.float32)

    # ConvTranspose2d(C, C, 4): weight (C_in, C_out, 4, 4), bias (C_out,)
    fan_in = C * KSIZE * KSIZE
    bound = 1.0 / (fan_in ** 0.5)
    weight = jax.random.uniform(kw_, (C, C, KSIZE, KSIZE), jnp.float32, -bound, bound)
    bias = jax.random.uniform(kb, (C,), jnp.float32, -bound, bound)

    y = jax.block_until_ready(upsample_conv_transpose(x, weight, bias))
    assert y.shape == (B, C, STRIDE * H, STRIDE * W), y.shape

    y_ref = _reference(x, weight, bias)
    err = float(jnp.max(jnp.abs(y - y_ref)))
    assert jnp.allclose(y, y_ref, atol=1e-4, rtol=1e-4), err
    print("KERNEL_OK")
</pallas_src>

<mosaic_0001>
module attributes {stable_mosaic.version = 11 : i64} {
  func.func @_upsample_kernel(%arg0: i32, %arg1: i32, %arg2: memref<1x18x18x4xf32, #tpu.memory_space<vmem>>, %arg3: memref<2x8x24xf32, #tpu.memory_space<vmem>>, %arg4: memref<8x1xf32, #tpu.memory_space<vmem>>, %arg5: memref<1x2x8x128xf32, #tpu.memory_space<vmem>>, %arg6: memref<128x24xf32, #tpu.memory_space<vmem>>) attributes {dimension_semantics = [#tpu.dimension_semantics<parallel>, #tpu.dimension_semantics<parallel>], iteration_bounds = array<i64: 2, 2>, scalar_prefetch = 0 : i64, scratch_operands = 1 : i64, tpu.core_type = #tpu.core_type<tc>, window_params = [{transform_indices = @transform_0, window_bounds = array<i64: 1, 18, 18, 4>}, {pipeline_mode = #tpu.pipeline_mode<synchronous>, transform_indices = @transform_1, window_bounds = array<i64: 2, 8, 24>}, {pipeline_mode = #tpu.pipeline_mode<synchronous>, transform_indices = @transform_2, window_bounds = array<i64: 8, 1>}, {transform_indices = @transform_3, window_bounds = array<i64: 1, 2, 8, 128>}]} {
    %c8_i32 = arith.constant 8 : i32
    %0 = arith.muli %arg1, %c8_i32 : i32
    %c0_i32 = arith.constant 0 : i32
    %1 = arith.addi %0, %c0_i32 : i32
    %c0_i32_0 = arith.constant 0 : i32
    %2 = arith.addi %1, %c0_i32_0 : i32
    %c0 = arith.constant 0 : index
    %3 = arith.index_cast %2 : i32 to index
    %c0_1 = arith.constant 0 : index
    %c0_2 = arith.constant 0 : index
    %4 = vector.load %arg2[%c0, %3, %c0_1, %c0_2] : memref<1x18x18x4xf32, #tpu.memory_space<vmem>>, vector<1x8x16x4xf32>
    %5 = vector.shape_cast %4 : vector<1x8x16x4xf32> to vector<8x16x4xf32>
    %6 = vector.shape_cast %5 : vector<8x16x4xf32> to vector<128x4xf32>
    %c0_3 = arith.constant 0 : index
    %c0_4 = arith.constant 0 : index
    %7 = vector.load %arg6[%c0_3, %c0_4] : memref<128x24xf32, #tpu.memory_space<vmem>>, vector<128x4xf32>
    tpu.vector_store %arg6[%c0_3, %c0_4], %6 {strides = array<i32>} : memref<128x24xf32, #tpu.memory_space<vmem>>, vector<128x4xf32>,
    %c0_i32_5 = arith.constant 0 : i32
    %8 = arith.addi %0, %c0_i32_5 : i32
    %c0_i32_6 = arith.constant 0 : i32
    %9 = arith.addi %8, %c0_i32_6 : i32
    %c0_7 = arith.constant 0 : index
    %10 = arith.index_cast %9 : i32 to index
    %c1 = arith.constant 1 : index
    %c0_8 = arith.constant 0 : index
    %11 = vector.load %arg2[%c0_7, %10, %c1, %c0_8] : memref<1x18x18x4xf32, #tpu.memory_space<vmem>>, vector<1x8x16x4xf32>
    %12 = vector.shape_cast %11 : vector<1x8x16x4xf32> to vector<8x16x4xf32>
    %13 = vector.shape_cast %12 : vector<8x16x4xf32> to vector<128x4xf32>
    %c0_9 = arith.constant 0 : index
    %c4 = arith.constant 4 : index
    %14 = vector.load %arg6[%c0_9, %c4] : memref<128x24xf32, #tpu.memory_space<vmem>>, vector<128x4xf32>
    tpu.vector_store %arg6[%c0_9, %c4], %13 {strides = array<i32>} : memref<128x24xf32, #tpu.memory_space<vmem>>, vector<128x4xf32>,
    %c0_i32_10 = arith.constant 0 : i32
    %15 = arith.addi %0, %c0_i32_10 : i32
    %c0_i32_11 = arith.constant 0 : i32
    %16 = arith.addi %15, %c0_i32_11 : i32
    %c0_12 = arith.constant 0 : index
    %17 = arith.index_cast %16 : i32 to index
    %c2 = arith.constant 2 : index
    %c0_13 = arith.constant 0 : index
    %18 = vector.load %arg2[%c0_12, %17, %c2, %c0_13] : memref<1x18x18x4xf32, #tpu.memory_space<vmem>>, vector<1x8x16x4xf32>
    %19 = vector.shape_cast %18 : vector<1x8x16x4xf32> to vector<8x16x4xf32>
    %20 = vector.shape_cast %19 : vector<8x16x4xf32> to vector<128x4xf32>
    %c0_14 = arith.constant 0 : index
    %c8 = arith.constant 8 : index
    %21 = vector.load %arg6[%c0_14, %c8] : memref<128x24xf32, #tpu.memory_space<vmem>>, vector<128x4xf32>
    tpu.vector_store %arg6[%c0_14, %c8], %20 {strides = array<i32>} : memref<128x24xf32, #tpu.memory_space<vmem>>, vector<128x4xf32>,
    %c0_i32_15 = arith.constant 0 : i32
    %22 = arith.addi %0, %c0_i32_15 : i32
    %c1_i32 = arith.constant 1 : i32
    %23 = arith.addi %22, %c1_i32 : i32
    %c0_16 = arith.constant 0 : index
    %24 = arith.index_cast %23 : i32 to index
    %c0_17 = arith.constant 0 : index
    %c0_18 = arith.constant 0 : index
    %25 = vector.load %arg2[%c0_16, %24, %c0_17, %c0_18] : memref<1x18x18x4xf32, #tpu.memory_space<vmem>>, vector<1x8x16x4xf32>
    %26 = vector.shape_cast %25 : vector<1x8x16x4xf32> to vector<8x16x4xf32>
    %27 = vector.shape_cast %26 : vector<8x16x4xf32> to vector<128x4xf32>
    %c0_19 = arith.constant 0 : index
    %c12 = arith.constant 12 : index
    %28 = vector.load %arg6[%c0_19, %c12] : memref<128x24xf32, #tpu.memory_space<vmem>>, vector<128x4xf32>
    tpu.vector_store %arg6[%c0_19, %c12], %27 {strides = array<i32>} : memref<128x24xf32, #tpu.memory_space<vmem>>, vector<128x4xf32>,
    %c0_i32_20 = arith.constant 0 : i32
    %29 = arith.addi %0, %c0_i32_20 : i32
    %c1_i32_21 = arith.constant 1 : i32
    %30 = arith.addi %29, %c1_i32_21 : i32
    %c0_22 = arith.constant 0 : index
    %31 = arith.index_cast %30 : i32 to index
    %c1_23 = arith.constant 1 : index
    %c0_24 = arith.constant 0 : index
    %32 = vector.load %arg2[%c0_22, %31, %c1_23, %c0_24] : memref<1x18x18x4xf32, #tpu.memory_space<vmem>>, vector<1x8x16x4xf32>
    %33 = vector.shape_cast %32 : vector<1x8x16x4xf32> to vector<8x16x4xf32>
    %34 = vector.shape_cast %33 : vector<8x16x4xf32> to vector<128x4xf32>
    %c0_25 = arith.constant 0 : index
    %c16 = arith.constant 16 : index
    %35 = vector.load %arg6[%c0_25, %c16] : memref<128x24xf32, #tpu.memory_space<vmem>>, vector<128x4xf32>
    tpu.vector_store %arg6[%c0_25, %c16], %34 {strides = array<i32>} : memref<128x24xf32, #tpu.memory_space<vmem>>, vector<128x4xf32>,
    %c0_i32_26 = arith.constant 0 : i32
    %36 = arith.addi %0, %c0_i32_26 : i32
    %c1_i32_27 = arith.constant 1 : i32
    %37 = arith.addi %36, %c1_i32_27 : i32
    %c0_28 = arith.constant 0 : index
    %38 = arith.index_cast %37 : i32 to index
    %c2_29 = arith.constant 2 : index
    %c0_30 = arith.constant 0 : index
    %39 = vector.load %arg2[%c0_28, %38, %c2_29, %c0_30] : memref<1x18x18x4xf32, #tpu.memory_space<vmem>>, vector<1x8x16x4xf32>
    %40 = vector.shape_cast %39 : vector<1x8x16x4xf32> to vector<8x16x4xf32>
    %41 = vector.shape_cast %40 : vector<8x16x4xf32> to vector<128x4xf32>
    %c0_31 = arith.constant 0 : index
    %c20 = arith.constant 20 : index
    %42 = vector.load %arg6[%c0_31, %c20] : memref<128x24xf32, #tpu.memory_space<vmem>>, vector<128x4xf32>
    tpu.vector_store %arg6[%c0_31, %c20], %41 {strides = array<i32>} : memref<128x24xf32, #tpu.memory_space<vmem>>, vector<128x4xf32>,
    %c0_32 = arith.constant 0 : index
    %c0_33 = arith.constant 0 : index
    %c0_34 = arith.constant 0 : index
    %43 = vector.load %arg3[%c0_32, %c0_33, %c0_34] : memref<2x8x24xf32, #tpu.memory_space<vmem>>, vector<1x8x24xf32>
    %44 = vector.shape_cast %43 : vector<1x8x24xf32> to vector<8x24xf32>
    %c0_35 = arith.constant 0 : index
    %c0_36 = arith.constant 0 : index
    %45 = vector.load %arg6[%c0_35, %c0_36] : memref<128x24xf32, #tpu.memory_space<vmem>>, vector<128x24xf32>
    %cst = arith.constant dense<0.000000e+00> : vector<8x128xf32>
    %46 = tpu.matmul %44, %45, %cst {dimension_numbers = #tpu.dot_dimension_numbers<[1], [1], [0], [0], [0, 0, 1, 0], [], []>} : vector<8x24xf32>, vector<128x24xf32>, vector<8x128xf32> -> vector<8x128xf32>
    %c0_37 = arith.constant 0 : index
    %c0_38 = arith.constant 0 : index
    %47 = vector.load %arg4[%c0_37, %c0_38] : memref<8x1xf32, #tpu.memory_space<vmem>>, vector<8x1xf32>
    %48 = vector.broadcast %47 : vector<8x1xf32> to vector<8x128xf32>
    %49 = arith.addf %46, %48 : vector<8x128xf32>
    %c0_39 = arith.constant 0 : index
    %c0_40 = arith.constant 0 : index
    %c0_41 = arith.constant 0 : index
    %c0_42 = arith.constant 0 : index
    %50 = vector.load %arg5[%c0_39, %c0_40, %c0_41, %c0_42] : memref<1x2x8x128xf32, #tpu.memory_space<vmem>>, vector<1x1x8x128xf32>
    %51 = vector.shape_cast %50 : vector<1x1x8x128xf32> to vector<8x128xf32>
    %52 = vector.shape_cast %49 : vector<8x128xf32> to vector<1x1x8x128xf32>
    tpu.vector_store %arg5[%c0_39, %c0_40, %c0_41, %c0_42], %52 {strides = array<i32>} : memref<1x2x8x128xf32, #tpu.memory_space<vmem>>, vector<1x1x8x128xf32>,
    %c1_i32_43 = arith.constant 1 : i32
    %53 = arith.addi %0, %c1_i32_43 : i32
    %c0_i32_44 = arith.constant 0 : i32
    %54 = arith.addi %53, %c0_i32_44 : i32
    %c0_45 = arith.constant 0 : index
    %55 = arith.index_cast %54 : i32 to index
    %c0_46 = arith.constant 0 : index
    %c0_47 = arith.constant 0 : index
    %56 = vector.load %arg2[%c0_45, %55, %c0_46, %c0_47] : memref<1x18x18x4xf32, #tpu.memory_space<vmem>>, vector<1x8x16x4xf32>
    %57 = vector.shape_cast %56 : vector<1x8x16x4xf32> to vector<8x16x4xf32>
    %58 = vector.shape_cast %57 : vector<8x16x4xf32> to vector<128x4xf32>
    %c0_48 = arith.constant 0 : index
    %c0_49 = arith.constant 0 : index
    %59 = vector.load %arg6[%c0_48, %c0_49] : memref<128x24xf32, #tpu.memory_space<vmem>>, vector<128x4xf32>
    tpu.vector_store %arg6[%c0_48, %c0_49], %58 {strides = array<i32>} : memref<128x24xf32, #tpu.memory_space<vmem>>, vector<128x4xf32>,
    %c1_i32_50 = arith.constant 1 : i32
    %60 = arith.addi %0, %c1_i32_50 : i32
    %c0_i32_51 = arith.constant 0 : i32
    %61 = arith.addi %60, %c0_i32_51 : i32
    %c0_52 = arith.constant 0 : index
    %62 = arith.index_cast %61 : i32 to index
    %c1_53 = arith.constant 1 : index
    %c0_54 = arith.constant 0 : index
    %63 = vector.load %arg2[%c0_52, %62, %c1_53, %c0_54] : memref<1x18x18x4xf32, #tpu.memory_space<vmem>>, vector<1x8x16x4xf32>
    %64 = vector.shape_cast %63 : vector<1x8x16x4xf32> to vector<8x16x4xf32>
    %65 = vector.shape_cast %64 : vector<8x16x4xf32> to vector<128x4xf32>
    %c0_55 = arith.constant 0 : index
    %c4_56 = arith.constant 4 : index
    %66 = vector.load %arg6[%c0_55, %c4_56] : memref<128x24xf32, #tpu.memory_space<vmem>>, vector<128x4xf32>
    tpu.vector_store %arg6[%c0_55, %c4_56], %65 {strides = array<i32>} : memref<128x24xf32, #tpu.memory_space<vmem>>, vector<128x4xf32>,
    %c1_i32_57 = arith.constant 1 : i32
    %67 = arith.addi %0, %c1_i32_57 : i32
    %c0_i32_58 = arith.constant 0 : i32
    %68 = arith.addi %67, %c0_i32_58 : i32
    %c0_59 = arith.constant 0 : index
    %69 = arith.index_cast %68 : i32 to index
    %c2_60 = arith.constant 2 : index
    %c0_61 = arith.constant 0 : index
    %70 = vector.load %arg2[%c0_59, %69, %c2_60, %c0_61] : memref<1x18x18x4xf32, #tpu.memory_space<vmem>>, vector<1x8x16x4xf32>
    %71 = vector.shape_cast %70 : vector<1x8x16x4xf32> to vector<8x16x4xf32>
    %72 = vector.shape_cast %71 : vector<8x16x4xf32> to vector<128x4xf32>
    %c0_62 = arith.constant 0 : index
    %c8_63 = arith.constant 8 : index
    %73 = vector.load %arg6[%c0_62, %c8_63] : memref<128x24xf32, #tpu.memory_space<vmem>>, vector<128x4xf32>
    tpu.vector_store %arg6[%c0_62, %c8_63], %72 {strides = array<i32>} : memref<128x24xf32, #tpu.memory_space<vmem>>, vector<128x4xf32>,
    %c1_i32_64 = arith.constant 1 : i32
    %74 = arith.addi %0, %c1_i32_64 : i32
    %c1_i32_65 = arith.constant 1 : i32
    %75 = arith.addi %74, %c1_i32_65 : i32
    %c0_66 = arith.constant 0 : index
    %76 = arith.index_cast %75 : i32 to index
    %c0_67 = arith.constant 0 : index
    %c0_68 = arith.constant 0 : index
    %77 = vector.load %arg2[%c0_66, %76, %c0_67, %c0_68] : memref<1x18x18x4xf32, #tpu.memory_space<vmem>>, vector<1x8x16x4xf32>
    %78 = vector.shape_cast %77 : vector<1x8x16x4xf32> to vector<8x16x4xf32>
    %79 = vector.shape_cast %78 : vector<8x16x4xf32> to vector<128x4xf32>
    %c0_69 = arith.constant 0 : index
    %c12_70 = arith.constant 12 : index
    %80 = vector.load %arg6[%c0_69, %c12_70] : memref<128x24xf32, #tpu.memory_space<vmem>>, vector<128x4xf32>
    tpu.vector_store %arg6[%c0_69, %c12_70], %79 {strides = array<i32>} : memref<128x24xf32, #tpu.memory_space<vmem>>, vector<128x4xf32>,
    %c1_i32_71 = arith.constant 1 : i32
    %81 = arith.addi %0, %c1_i32_71 : i32
    %c1_i32_72 = arith.constant 1 : i32
    %82 = arith.addi %81, %c1_i32_72 : i32
    %c0_73 = arith.constant 0 : index
    %83 = arith.index_cast %82 : i32 to index
    %c1_74 = arith.constant 1 : index
    %c0_75 = arith.constant 0 : index
    %84 = vector.load %arg2[%c0_73, %83, %c1_74, %c0_75] : memref<1x18x18x4xf32, #tpu.memory_space<vmem>>, vector<1x8x16x4xf32>
    %85 = vector.shape_cast %84 : vector<1x8x16x4xf32> to vector<8x16x4xf32>
    %86 = vector.shape_cast %85 : vector<8x16x4xf32> to vector<128x4xf32>
    %c0_76 = arith.constant 0 : index
    %c16_77 = arith.constant 16 : index
    %87 = vector.load %arg6[%c0_76, %c16_77] : memref<128x24xf32, #tpu.memory_space<vmem>>, vector<128x4xf32>
    tpu.vector_store %arg6[%c0_76, %c16_77], %86 {strides = array<i32>} : memref<128x24xf32, #tpu.memory_space<vmem>>, vector<128x4xf32>,
    %c1_i32_78 = arith.constant 1 : i32
    %88 = arith.addi %0, %c1_i32_78 : i32
    %c1_i32_79 = arith.constant 1 : i32
    %89 = arith.addi %88, %c1_i32_79 : i32
    %c0_80 = arith.constant 0 : index
    %90 = arith.index_cast %89 : i32 to index
    %c2_81 = arith.constant 2 : index
    %c0_82 = arith.constant 0 : index
    %91 = vector.load %arg2[%c0_80, %90, %c2_81, %c0_82] : memref<1x18x18x4xf32, #tpu.memory_space<vmem>>, vector<1x8x16x4xf32>
    %92 = vector.shape_cast %91 : vector<1x8x16x4xf32> to vector<8x16x4xf32>
    %93 = vector.shape_cast %92 : vector<8x16x4xf32> to vector<128x4xf32>
    %c0_83 = arith.constant 0 : index
    %c20_84 = arith.constant 20 : index
    %94 = vector.load %arg6[%c0_83, %c20_84] : memref<128x24xf32, #tpu.memory_space<vmem>>, vector<128x4xf32>
    tpu.vector_store %arg6[%c0_83, %c20_84], %93 {strides = array<i32>} : memref<128x24xf32, #tpu.memory_space<vmem>>, vector<128x4xf32>,
    %c1_85 = arith.constant 1 : index
    %c0_86 = arith.constant 0 : index
    %c0_87 = arith.constant 0 : index
    %95 = vector.load %arg3[%c1_85, %c0_86, %c0_87] : memref<2x8x24xf32, #tpu.memory_space<vmem>>, vector<1x8x24xf32>
    %96 = vector.shape_cast %95 : vector<1x8x24xf32> to vector<8x24xf32>
    %c0_88 = arith.constant 0 : index
    %c0_89 = arith.constant 0 : index
    %97 = vector.load %arg6[%c0_88, %c0_89] : memref<128x24xf32, #tpu.memory_space<vmem>>, vector<128x24xf32>
    %cst_90 = arith.constant dense<0.000000e+00> : vector<8x128xf32>
    %98 = tpu.matmul %96, %97, %cst_90 {dimension_numbers = #tpu.dot_dimension_numbers<[1], [1], [0], [0], [0, 0, 1, 0], [], []>} : vector<8x24xf32>, vector<128x24xf32>, vector<8x128xf32> -> vector<8x128xf32>
    %c0_91 = arith.constant 0 : index
    %c0_92 = arith.constant 0 : index
    %99 = vector.load %arg4[%c0_91, %c0_92] : memref<8x1xf32, #tpu.memory_space<vmem>>, vector<8x1xf32>
    %100 = vector.broadcast %99 : vector<8x1xf32> to vector<8x128xf32>
    %101 = arith.addf %98, %100 : vector<8x128xf32>
    %c0_93 = arith.constant 0 : index
    %c1_94 = arith.constant 1 : index
    %c0_95 = arith.constant 0 : index
    %c0_96 = arith.constant 0 : index
    %102 = vector.load %arg5[%c0_93, %c1_94, %c0_95, %c0_96] : memref<1x2x8x128xf32, #tpu.memory_space<vmem>>, vector<1x1x8x128xf32>
    %103 = vector.shape_cast %102 : vector<1x1x8x128xf32> to vector<8x128xf32>
    %104 = vector.shape_cast %101 : vector<8x128xf32> to vector<1x1x8x128xf32>
    tpu.vector_store %arg5[%c0_93, %c1_94, %c0_95, %c0_96], %104 {strides = array<i32>} : memref<1x2x8x128xf32, #tpu.memory_space<vmem>>, vector<1x1x8x128xf32>,
    return
  }
  func.func @transform_0(%arg0: i32, %arg1: i32) -> (i32, i32, i32, i32) {
    %c0_i32 = arith.constant 0 : i32
    %c0_i32_0 = arith.constant 0 : i32
    %c0_i32_1 = arith.constant 0 : i32
    %c0_i32_2 = arith.constant 0 : i32
    return %arg0, %c0_i32, %c0_i32_0, %c0_i32_1 : i32, i32, i32, i32
  }
  func.func @transform_1(%arg0: i32, %arg1: i32) -> (i32, i32, i32) {
    %c0_i32 = arith.constant 0 : i32
    %c0_i32_0 = arith.constant 0 : i32
    %c0_i32_1 = arith.constant 0 : i32
    %c0_i32_2 = arith.constant 0 : i32
    return %c0_i32, %c0_i32_0, %c0_i32_1 : i32, i32, i32
  }
  func.func @transform_2(%arg0: i32, %arg1: i32) -> (i32, i32) {
    %c0_i32 = arith.constant 0 : i32
    %c0_i32_0 = arith.constant 0 : i32
    %c0_i32_1 = arith.constant 0 : i32
    return %c0_i32, %c0_i32_0 : i32, i32
  }
  func.func @transform_3(%arg0: i32, %arg1: i32) -> (i32, i32, i32, i32) {
    %c0_i32 = arith.constant 0 : i32
    %c0_i32_0 = arith.constant 0 : i32
    %c0_i32_1 = arith.constant 0 : i32
    return %arg0, %c0_i32, %c0_i32_0, %arg1 : i32, i32, i32, i32
  }
}

</mosaic_0001>

<bundles_post_ra>
// kernel: tile.8
= control target key start
LH: loop header
LB: loop body
LE: loop exit
PB: predicated region body
PF: predicated region fallthrough
CT: control target
= control target key end

     0   :  { %s22_s0 = inlined_call_operand.vmem [shape: f32[4], index: 0, kind: input, shape index: {}]   ;;  %s23_s1 = inlined_call_operand.vmem [shape: f32[2,4], index: 1, kind: output, shape index: {}]  }
   0x1   :  { %v4_v0 = vld [vmem:[%s22_s0] ss:$0 sm:$0xff] }
   0x2   :  { %5 = vst [vmem:[%s23_s1] sm:$0x3] %v4_v0 }

// kernel: tile.0
= control target key start
LH: loop header
LB: loop body
LE: loop exit
PB: predicated region body
PF: predicated region fallthrough
CT: control target
= control target key end

     0   :  { %s34_s8 = smov 125   ;;  %vm7_vm0 = vcmask 7168   ;;  %s35_s11 = smov 126   ;;  %s61_s0 = inlined_call_operand.vmem [shape: f32[2,4], index: 0, kind: input, shape index: {}]   ;;  %s62_s1 = inlined_call_operand.vmem [shape: f32[8,1], index: 1, kind: output, shape index: {}]  }
   0x1   :  { %v4_v0 = vld [vmem:[%s61_s0] sm:$0x3]  ;;  %s33_s0 = smov 127  }
   0x2   :  { %5 = vst [vmem:[#allocation0] sm:$0x3] %v4_v0 }
   0x9   :  { %v9_v1 = vld [vmem:[#allocation0] sm:$0x3]  }
   0xa   :  { %v21_v2 = vld [vmem:[#allocation0] sm:$0x3]   ;;  %10 = vrot.lane.b32.xlu0 %v9_v1, %s33_s0 }
   0xb   :  { %22 = vrot.lane.b32.xlu1 %v21_v2, %s34_s8  ;;  %v6_v3 = vld [vmem:[#allocation0] sm:$0x3]  }
   0xc   :  { %v15_v4 = vld [vmem:[#allocation0] sm:$0x3]   ;;  %8 = vst.msk [vmem:[%s62_s1] ss:$4 sm:$0x3] %vm7_vm0, %v6_v3  }
   0xe   :  { %16 = vrot.lane.b32.xlu0 %v15_v4, %s35_s11 }
  0x7c   :  { %v11_v5 = vpop.permute.xlu0 %10  }
  0x7d   :  { %v23_v6 = vpop.permute.xlu1 %22   ;;  %27 = vst.msk [vmem:[%s62_s1 + $0x1] ss:$4 sm:$0x3] %vm7_vm0, %v11_v5  }
  0x7e   :  { %29 = vst.msk [vmem:[%s62_s1 + $0x3] ss:$4 sm:$0x3] %vm7_vm0, %v23_v6  }
  0x80   :  { %v17_v7 = vpop.permute.xlu0 %16  }
  0x81   :  { %28 = vst.msk [vmem:[%s62_s1 + $0x2] ss:$4 sm:$0x3] %vm7_vm0, %v17_v7  }

// kernel: upsample_conv_transpose.1
= control target key start
LH: loop header
LB: loop body
LE: loop exit
PB: predicated region body
PF: predicated region fallthrough
CT: control target
= control target key end

     0   :  { %s2151_s12 = smov 0   ;;  %s2153_s13 = smov 0   ;;  %s2912_s0 = inlined_call_operand.vmem [shape: f32[2,18,18,4], index: 0, kind: input, shape index: {}]   ;;  %s2913_s1 = inlined_call_operand.vmem [shape: f32[2,8,24], index: 1, kind: input, shape index: {}]   ;;  %s2914_s2 = inlined_call_operand.vmem [shape: f32[8,1], index: 2, kind: input, shape index: {}]   ;;  %s2915_s3 = inlined_call_operand.vmem [shape: f32[2,2,8,256], index: 3, kind: output, shape index: {}]  }
   0x1   :  { %s2155_s14 = smov 0   ;;  %s2157_s15 = smov 0  }
   0x2   :  { %s2159_s16 = smov 0   ;;  %s2161_s17 = smov 0  }
   0x3   :  { %s2163_s18 = smov 0  }
   0x4 LB: > { %s22_s19 = sadd.s32 1, %s2112_s16  ;;  %s25_s20 = sadd.s32 1, %s2116_s17  ;;  %s2120_s18 = sphi %s2163_s18, %s13_s18   ;;  %s2116_s17 = sphi %s2161_s17, %s2924_s17   ;;  %s2112_s16 = sphi %s2159_s16, %s2923_s16   ;;  %s2108_s15 = sphi %s2157_s15, %s2922_s15   ;;  %s2104_s14 = sphi %s2155_s14, %s2921_s14   ;;  %s2100_s13 = sphi %s2153_s13, %s2920_s13   ;;  %s2096_s12 = sphi %s2151_s12, %s2919_s12  }
   0x5   : > { %p23_p0 = scmp.ge.s32.totalorder %s22_s19, 2  ;;  %s1632_s21 = sadd.s32 4294967295, %s2120_s18  }
   0x6   : > { %p112_p1 = scmp.ne.s32.totalorder %s2100_s13, %s2096_s12  ;;  %p113_p2 = scmp.eq.s32.totalorder %s1632_s21, 3 }
   0x7   : > { %s2926_s19 = smov (%p23_p0, %s22_s19), 0  ;;  %s2928_s20 = smov (!%p23_p0, %s25_s20), %s2116_s17 }
   0x8   : > { %s98_s22 = ssub.s32 %s2112_s16, %s2926_s19  ;;  %p27_p3 = scmp.ge.s32.totalorder %s2928_s20, 2 }
   0x9   : > { %p1636_p4 = scmp.ge.s32.totalorder %s2120_s18, 1  ;;  %p2197_p5 = por %p113_p2, %p112_p1 }
   0xa   : > { %p151_p6 = scmp.lt.s32.totalorder %s2120_s18, 5  ;;  %s2930_s20 = smov (%p27_p3, %s2928_s20), 0 }
   0xb   : > { %s97_s24 = ssub.s32 %s2116_s17, %s2930_s20  ;;  %s102_s26 = sadd.s32 1, %s2100_s13 }
   0xc   : > { %p152_p7 = pnand %p1636_p4, %p151_p6  ;;  %s99_s25 = sor.u32 %s98_s22, %s97_s24 }
   0xd   : > { %p100_p8 = scmp.eq.s32.totalorder %s99_s25, 0  ;;  %p174_p9 = scmp.lt.s32.totalorder (!%p152_p7), %s2108_s15, 1  ;;  %vm198_vm0 = vcmask (!%p152_p7), 31744   ;;  %v2126_v18 = vmov (!%p152_p7), 0.0|0.0   ;;  %vm295_vm1 = vcmask (!%p152_p7), 64544   ;;  %vm392_vm2 = vcmask (!%p152_p7), 97344  }
   0xe   : > { %155 = sbr.rel (%p152_p7) target bundleno = 700 (0x2bc), region = 32  ;;  %s2122_s8 = smov (!%p152_p7), 8   ;;  %1934 = vmatprep.subr.bf16.mxu0 (!%p152_p7), %v2126_v18  ;;  %1966 = vmatprep.subr.bf16.mxu1 (!%p152_p7), %v2126_v18  ;;  %vm492_vm3 = vcmask (!%p152_p7), 130144   ;;  %vm589_vm4 = vcmask (!%p152_p7), 162944   ;;  %vm686_vm5 = vcmask (!%p152_p7), 195744   ;;  %vm726_vm6 = vcmask (!%p152_p7), 195584  }
   0xf   : > { %s2208_s27 = scalar_select %p100_p8, %s2100_s13, %s102_s26  }
  0x10   : > { %s1640_s29 = smul.u32 (!%p152_p7), 192, %s2104_s14  ;;  %s2123_s9 = smov (!%p152_p7), 4   ;;  %vm2428_vm7 = vmpackc.low (!%p152_p7), %vm726_vm6, %vm726_vm6  ;;  %vm2128_vm8 = vmmov (!%p152_p7), 0  }
  0x11   : > { %s2124_s10 = smov (!%p152_p7), 12   ;;  %s2125_s11 = smov (!%p152_p7), 16  }
  0x12   : > { %s2127_s21 = smov (!%p152_p7), 20  }
  0x15   : > { %s175_s28 = scalar_select %p174_p9, %s2108_s15, 1 }
  0x17   : > { %s1998_s30 = smul.u32 432, %s175_s28 }
  0x19   : > { %s178_s6 = scalar_lea.vmem %s2912_s0, %s1998_s30  ;;  %s171_s30 = sand.u32 1, %s2096_s12  }
  0x1a   : > { %s2216_s7 = scalar_lea.vmem %s178_s6, %s1640_s29  ;;  %s1637_s4 = sshll.u32 %s171_s30, 4 }
  0x1b   : > { %v312_v0 = vld [vmem:[%s2216_s7 + $0x2] sm:$0xff]  ;;  %v313_v3 = vld [vmem:[%s2216_s7 + $0xa] sm:$0xff]  ;;  %v2228_v5 = vld [vmem:[%s2216_s7 + $0x18] sm:$0xff]  ;;  %s173_s5 = scalar_lea.vmem [#allocation3], %s1637_s4  ;;  %s1826_s6 = sshll.u32 (%p2197_p5), %s2108_s15, 2 }
  0x1c   : > { %v215_v1 = vld [vmem:[%s2216_s7 + $0x1] sm:$0xff]  ;;  %344 = vrot.lane.b32.xlu1 %v312_v0, %s2122_s8  ;;  %v216_v4 = vld [vmem:[%s2216_s7 + $0x9] sm:$0xff]  ;;  %v2233_v6 = vld [vmem:[%s2216_s7 + $0x38] sm:$0xff]  ;;  %201 = vst.msk [vmem:[#allocation2 + $0x10] sm:$0xff] %vm198_vm0, %v2228_v5 }
  0x1d   : > { %247 = vrot.lane.b32.xlu0 %v215_v1, %s2123_s9  ;;  %v2223_v2 = vld [vmem:[%s2216_s7 + $0x20] sm:$0xff]  ;;  %v2238_v7 = vld [vmem:[%s2216_s7 + $0x30] sm:$0xff]  ;;  %204 = vst.msk [vmem:[#allocation2 + $0x28] sm:$0xff] %vm198_vm0, %v2233_v6  ;;  %v2250_v9 = vld [vmem:[%s2216_s7 + $0x48] sm:$0xff] }
  0x1e   : > { %202 = vst.msk [vmem:[#allocation2 + $0x18] sm:$0xff] %vm198_vm0, %v2223_v2  ;;  %203 = vst.msk [vmem:[#allocation2 + $0x20] sm:$0xff] %vm198_vm0, %v2238_v7  ;;  %v2247_v8 = vld [vmem:[%s2216_s7 + $0x50] sm:$0xff]  ;;  %v2257_v10 = vld [vmem:[%s2216_s7 + $0x68] sm:$0xff] }
  0x1f   : > { %206 = vst.msk [vmem:[#allocation2 + $0x38] sm:$0xff] %vm198_vm0, %v2247_v8  ;;  %205 = vst.msk [vmem:[#allocation2 + $0x30] sm:$0xff] %vm198_vm0, %v2250_v9  ;;  %v2260_v11 = vld [vmem:[%s2216_s7 + $0x60] sm:$0xff]  ;;  %v183_v15 = vld [vmem:[%s2216_s7 + $0x8] sm:$0xff] }
  0x20   : > { %346 = vrot.lane.b32.xlu1 %v313_v3, %s2122_s8  ;;  %v182_v12 = vld [vmem:[%s2216_s7] sm:$0xff]  ;;  %208 = vst.msk [vmem:[#allocation2 + $0x48] sm:$0xff] %vm198_vm0, %v2257_v10  ;;  %207 = vst.msk [vmem:[#allocation2 + $0x40] sm:$0xff] %vm198_vm0, %v2260_v11  ;;  %v2288_v20 = vld [vmem:[%s2216_s7 + $0x78] sm:$0xff] }
  0x21   : > { %249 = vrot.lane.b32.xlu0 %v216_v4, %s2123_s9  ;;  %v1660_v13 = vld [vmem:[%s2216_s7 + $0x21] sm:$0xff]  ;;  %v1659_v14 = vld [vmem:[%s2216_s7 + $0x19] sm:$0xff]  ;;  %199 = vst.msk [vmem:[#allocation2] sm:$0xff] %vm198_vm0, %v182_v12  ;;  %200 = vst.msk [vmem:[#allocation2 + $0x8] sm:$0xff] %vm198_vm0, %v183_v15 }
  0x22   : > { %v1676_v16 = vld [vmem:[%s2216_s7 + $0x22] sm:$0xff]  ;;  %v1675_v17 = vld [vmem:[%s2216_s7 + $0x1a] sm:$0xff]  ;;  %209 = vst.msk [vmem:[#allocation2 + $0x50] sm:$0xff] %vm198_vm0, %v2288_v20  ;;  %v1661_v22 = vld [vmem:[%s2216_s7 + $0x31] sm:$0xff] }
  0x23   : > { %v2285_v19 = vld [vmem:[%s2216_s7 + $0x80] sm:$0xff]  ;;  %v1677_v24 = vld [vmem:[%s2216_s7 + $0x32] sm:$0xff]  ;;  %v1663_v28 = vld [vmem:[%s2216_s7 + $0x49] sm:$0xff] }
  0x24   : > { %446 = vrot.lane.b32.xlu1 %v2223_v2, %s2124_s10  ;;  %210 = vst.msk [vmem:[#allocation2 + $0x58] sm:$0xff] %vm198_vm0, %v2285_v19  ;;  %v1662_v21 = vld [vmem:[%s2216_s7 + $0x39] sm:$0xff]  ;;  %v2326_v26 = vld [vmem:[%s2216_s7 + $0x90] sm:$0xff]  ;;  %v2364_v32 = vld [vmem:[%s2216_s7 + $0xa8] sm:$0xff] }
  0x25   : > { %444 = vrot.lane.b32.xlu0 %v2228_v5, %s2124_s10  ;;  %v1678_v23 = vld [vmem:[%s2216_s7 + $0x3a] sm:$0xff]  ;;  %211 = vst.msk [vmem:[#allocation2 + $0x60] sm:$0xff] %vm198_vm0, %v2326_v26  ;;  %v1664_v27 = vld [vmem:[%s2216_s7 + $0x51] sm:$0xff]  ;;  %213 = vst.msk [vmem:[#allocation2 + $0x70] sm:$0xff] %vm198_vm0, %v2364_v32 }
  0x26   : > { %v2323_v25 = vld [vmem:[%s2216_s7 + $0x98] sm:$0xff]  ;;  %v1679_v30 = vld [vmem:[%s2216_s7 + $0x4a] sm:$0xff]  ;;  %v2382_v34 = vld [vmem:[%s2216_s7 + $0x61] sm:$0xff] }
  0x27   : > { %212 = vst.msk [vmem:[#allocation2 + $0x68] sm:$0xff] %vm198_vm0, %v2323_v25  ;;  %v1680_v29 = vld [vmem:[%s2216_s7 + $0x52] sm:$0xff]  ;;  %v2379_v33 = vld [vmem:[%s2216_s7 + $0x69] sm:$0xff]  ;;  %v2458_v59 = vld [vmem:[%s2216_s7 + $0x81] sm:$0xff] }
  0x28   : > { %543 = vrot.lane.b32.xlu1 %v1660_v13, %s2125_s11  ;;  %v2361_v31 = vld [vmem:[%s2216_s7 + $0xb0] sm:$0xff]  ;;  %v2392_v36 = vld [vmem:[%s2216_s7 + $0x62] sm:$0xff]  ;;  %v2461_v60 = vld [vmem:[%s2216_s7 + $0x79] sm:$0xff] }
  0x29   : > { %541 = vrot.lane.b32.xlu0 %v1659_v14, %s2125_s11  ;;  %214 = vst.msk [vmem:[#allocation2 + $0x78] sm:$0xff] %vm198_vm0, %v2361_v31  ;;  %v2389_v35 = vld [vmem:[%s2216_s7 + $0x6a] sm:$0xff]  ;;  %v2470_v63 = vld [vmem:[%s2216_s7 + $0x82] sm:$0xff]  ;;  %v2473_v0 = vld [vmem:[%s2216_s7 + $0x7a] sm:$0xff] }
  0x2c   : > { %640 = vrot.lane.b32.xlu1 %v1676_v16, %s2127_s21 }
  0x2d   : > { %638 = vrot.lane.b32.xlu0 %v1675_v17, %s2127_s21 }
  0x30   : > { %253 = vrot.lane.b32.xlu1 %v1660_v13, %s2123_s9 }
  0x31   : > { %251 = vrot.lane.b32.xlu0 %v1659_v14, %s2123_s9 }
  0x34   : > { %350 = vrot.lane.b32.xlu1 %v1676_v16, %s2122_s8 }
  0x35   : > { %348 = vrot.lane.b32.xlu0 %v1675_v17, %s2122_s8 }
  0x38   : > { %450 = vrot.lane.b32.xlu1 %v2233_v6, %s2124_s10 }
  0x39   : > { %448 = vrot.lane.b32.xlu0 %v2238_v7, %s2124_s10 }
  0x3c   : > { %547 = vrot.lane.b32.xlu1 %v1662_v21, %s2125_s11 }
  0x3d   : > { %545 = vrot.lane.b32.xlu0 %v1661_v22, %s2125_s11 }
  0x40   : > { %644 = vrot.lane.b32.xlu1 %v1678_v23, %s2127_s21 }
  0x41   : > { %642 = vrot.lane.b32.xlu0 %v1677_v24, %s2127_s21 }
  0x44   : > { %915 = vrot.lane.b32.xlu1 %v1660_v13, %s2123_s9 }
  0x45   : > { %913 = vrot.lane.b32.xlu0 %v1659_v14, %s2123_s9 }
  0x48   : > { %1011 = vrot.lane.b32.xlu1 %v1676_v16, %s2122_s8 }
  0x49   : > { %1009 = vrot.lane.b32.xlu0 %v1675_v17, %s2122_s8 }
  0x4c   : > { %1110 = vrot.lane.b32.xlu1 %v2233_v6, %s2124_s10 }
  0x4d   : > { %1108 = vrot.lane.b32.xlu0 %v2238_v7, %s2124_s10 }
  0x50   : > { %257 = vrot.lane.b32.xlu1 %v1662_v21, %s2123_s9 }
  0x51   : > { %255 = vrot.lane.b32.xlu0 %v1661_v22, %s2123_s9 }
  0x54   : > { %1206 = vrot.lane.b32.xlu1 %v1662_v21, %s2125_s11 }
  0x55   : > { %1204 = vrot.lane.b32.xlu0 %v1661_v22, %s2125_s11 }
  0x58   : > { %354 = vrot.lane.b32.xlu1 %v1678_v23, %s2122_s8 }
  0x59   : > { %352 = vrot.lane.b32.xlu0 %v1677_v24, %s2122_s8 }
  0x5c   : > { %1302 = vrot.lane.b32.xlu1 %v1678_v23, %s2127_s21 }
  0x5d   : > { %1300 = vrot.lane.b32.xlu0 %v1677_v24, %s2127_s21 }
  0x60   : > { %454 = vrot.lane.b32.xlu1 %v2247_v8, %s2124_s10 }
  0x61   : > { %452 = vrot.lane.b32.xlu0 %v2250_v9, %s2124_s10 }
  0x64   : > { %551 = vrot.lane.b32.xlu1 %v1664_v27, %s2125_s11 }
  0x65   : > { %549 = vrot.lane.b32.xlu0 %v1663_v28, %s2125_s11 }
  0x68   : > { %648 = vrot.lane.b32.xlu1 %v1680_v29, %s2127_s21 }
  0x69   : > { %646 = vrot.lane.b32.xlu0 %v1679_v30, %s2127_s21 }
  0x6c   : > { %919 = vrot.lane.b32.xlu1 %v1662_v21, %s2123_s9 }
  0x6d   : > { %917 = vrot.lane.b32.xlu0 %v1661_v22, %s2123_s9 }
  0x70   : > { %1015 = vrot.lane.b32.xlu1 %v1678_v23, %s2122_s8 }
  0x71   : > { %1013 = vrot.lane.b32.xlu0 %v1677_v24, %s2122_s8 }
  0x74   : > { %1114 = vrot.lane.b32.xlu1 %v2247_v8, %s2124_s10 }
  0x75   : > { %1112 = vrot.lane.b32.xlu0 %v2250_v9, %s2124_s10 }
  0x78   : > { %261 = vrot.lane.b32.xlu1 %v1664_v27, %s2123_s9 }
  0x79   : > { %259 = vrot.lane.b32.xlu0 %v1663_v28, %s2123_s9 }
  0x7c   : > { %1210 = vrot.lane.b32.xlu1 %v1664_v27, %s2125_s11 }
  0x7d   : > { %1208 = vrot.lane.b32.xlu0 %v1663_v28, %s2125_s11 }
  0x80   : > { %358 = vrot.lane.b32.xlu1 %v1680_v29, %s2122_s8 }
  0x81   : > { %356 = vrot.lane.b32.xlu0 %v1679_v30, %s2122_s8 }
  0x84   : > { %1306 = vrot.lane.b32.xlu1 %v1680_v29, %s2127_s21 }
  0x85   : > { %1304 = vrot.lane.b32.xlu0 %v1679_v30, %s2127_s21 }
  0x88   : > { %458 = vrot.lane.b32.xlu1 %v2257_v10, %s2124_s10 }
  0x89   : > { %456 = vrot.lane.b32.xlu0 %v2260_v11, %s2124_s10 }
  0x8c   : > { %555 = vrot.lane.b32.xlu1 %v2379_v33, %s2125_s11 }
  0x8d   : > { %553 = vrot.lane.b32.xlu0 %v2382_v34, %s2125_s11 }
  0x8e   : > { %v345_v37 = vpop.permute.xlu1 %344 }
  0x8f   : > { %v248_v38 = vpop.permute.xlu0 %247 }
  0x90   : > { %296 = vst.msk [vmem:[#allocation2] sm:$0xff] %vm295_vm1, %v248_v38  ;;  %652 = vrot.lane.b32.xlu1 %v2389_v35, %s2127_s21 }
  0x91   : > { %650 = vrot.lane.b32.xlu0 %v2392_v36, %s2127_s21  ;;  %393 = vst.msk [vmem:[#allocation2] sm:$0xff] %vm392_vm2, %v345_v37  ;;  %v2542_v37 = vld [vmem:[%s2216_s7 + $0x91] sm:$0xff] }
  0x92   : > { %v347_v39 = vpop.permute.xlu1 %346 }
  0x93   : > { %v250_v40 = vpop.permute.xlu0 %249 }
  0x94   : > { %297 = vst.msk [vmem:[#allocation2 + $0x8] sm:$0xff] %vm295_vm1, %v250_v40  ;;  %923 = vrot.lane.b32.xlu1 %v1664_v27, %s2123_s9  ;;  %v2552_v40 = vld [vmem:[%s2216_s7 + $0x9a] sm:$0xff] }
  0x95   : > { %921 = vrot.lane.b32.xlu0 %v1663_v28, %s2123_s9  ;;  %394 = vst.msk [vmem:[#allocation2 + $0x8] sm:$0xff] %vm392_vm2, %v347_v39 }
  0x96   : > { %v447_v41 = vpop.permute.xlu1 %446 }
  0x97   : > { %v445_v42 = vpop.permute.xlu0 %444  ;;  %494 = vst.msk [vmem:[#allocation2 + $0x8] sm:$0xff] %vm492_vm3, %v447_v41  ;;  %v2555_v41 = vld [vmem:[%s2216_s7 + $0x92] sm:$0xff] }
  0x98   : > { %493 = vst.msk [vmem:[#allocation2] sm:$0xff] %vm492_vm3, %v445_v42  ;;  %1019 = vrot.lane.b32.xlu1 %v1680_v29, %s2122_s8 }
  0x99   : > { %1017 = vrot.lane.b32.xlu0 %v1679_v30, %s2122_s8 }
  0x9a   : > { %v544_v43 = vpop.permute.xlu1 %543 }
  0x9b   : > { %v542_v44 = vpop.permute.xlu0 %541  ;;  %591 = vst.msk [vmem:[#allocation2 + $0x8] sm:$0xff] %vm589_vm4, %v544_v43 }
  0x9c   : > { %590 = vst.msk [vmem:[#allocation2] sm:$0xff] %vm589_vm4, %v542_v44  ;;  %1118 = vrot.lane.b32.xlu1 %v2257_v10, %s2124_s10 }
  0x9d   : > { %1116 = vrot.lane.b32.xlu0 %v2260_v11, %s2124_s10 }
  0x9e   : > { %v641_v45 = vpop.permute.xlu1 %640 }
  0x9f   : > { %v639_v46 = vpop.permute.xlu0 %638  ;;  %688 = vst.msk [vmem:[#allocation2 + $0x8] sm:$0xff] %vm686_vm5, %v641_v45 }
  0xa0   : > { %687 = vst.msk [vmem:[#allocation2] sm:$0xff] %vm686_vm5, %v639_v46  ;;  %265 = vrot.lane.b32.xlu1 %v2379_v33, %s2123_s9 }
  0xa1   : > { %263 = vrot.lane.b32.xlu0 %v2382_v34, %s2123_s9 }
  0xa2   : > { %v254_v47 = vpop.permute.xlu1 %253 }
  0xa3   : > { %v252_v48 = vpop.permute.xlu0 %251  ;;  %299 = vst.msk [vmem:[#allocation2 + $0x18] sm:$0xff] %vm295_vm1, %v254_v47 }
  0xa4   : > { %298 = vst.msk [vmem:[#allocation2 + $0x10] sm:$0xff] %vm295_vm1, %v252_v48  ;;  %1214 = vrot.lane.b32.xlu1 %v2379_v33, %s2125_s11 }
  0xa5   : > { %1212 = vrot.lane.b32.xlu0 %v2382_v34, %s2125_s11 }
  0xa6   : > { %v351_v49 = vpop.permute.xlu1 %350  ;;  %v705_v52 = vld [vmem:[#allocation2 + $0x8] sm:$0xff] }
  0xa7   : > { %v349_v50 = vpop.permute.xlu0 %348  ;;  %v704_v51 = vld [vmem:[#allocation2] sm:$0xff]  ;;  %396 = vst.msk [vmem:[#allocation2 + $0x18] sm:$0xff] %vm392_vm2, %v351_v49 }
  0xa8   : > { %395 = vst.msk [vmem:[#allocation2 + $0x10] sm:$0xff] %vm392_vm2, %v349_v50  ;;  %v1935_v54 = vpack.c.bf16 %v705_v52, %v704_v51  ;;  %362 = vrot.lane.b32.xlu1 %v2389_v35, %s2122_s8 }
  0xa9   : > { %866 = vst.msk [vmem:[#allocation2 + $0x8] sm:$0xff] %vm198_vm0, %v2223_v2  ;;  %865 = vst.msk [vmem:[#allocation2] sm:$0xff] %vm198_vm0, %v2228_v5  ;;  %360 = vrot.lane.b32.xlu0 %v2392_v36, %s2122_s8 }
  0xaa   : > { %1937 = vmatpush3.bf16.xpose.msk.msra.mxu0 %vm2428_vm7, %v1935_v54  ;;  %v451_v55 = vpop.permute.xlu1 %450 }
  0xab   : > { %v449_v56 = vpop.permute.xlu0 %448  ;;  %1938 = vmatprep.subr.bf16.mxu0 %v2126_v18  ;;  %496 = vst.msk [vmem:[#allocation2 + $0x18] sm:$0xff] %vm492_vm3, %v451_v55 }
  0xac   : > { %495 = vst.msk [vmem:[#allocation2 + $0x10] sm:$0xff] %vm492_vm3, %v449_v56  ;;  %1310 = vrot.lane.b32.xlu1 %v2389_v35, %s2127_s21 }
  0xad   : > { %1308 = vrot.lane.b32.xlu0 %v2392_v36, %s2127_s21 }
  0xae   : > { %v548_v57 = vpop.permute.xlu1 %547 }
  0xaf   : > { %v546_v58 = vpop.permute.xlu0 %545  ;;  %593 = vst.msk [vmem:[#allocation2 + $0x18] sm:$0xff] %vm589_vm4, %v548_v57 }
  0xb0   : > { %592 = vst.msk [vmem:[#allocation2 + $0x10] sm:$0xff] %vm589_vm4, %v546_v58  ;;  %462 = vrot.lane.b32.xlu1 %v2285_v19, %s2124_s10 }
  0xb1   : > { %460 = vrot.lane.b32.xlu0 %v2288_v20, %s2124_s10 }
  0xb2   : > { %v645_v61 = vpop.permute.xlu1 %644 }
  0xb3   : > { %v643_v62 = vpop.permute.xlu0 %642  ;;  %690 = vst.msk [vmem:[#allocation2 + $0x18] sm:$0xff] %vm686_vm5, %v645_v61 }
  0xb4   : > { %689 = vst.msk [vmem:[#allocation2 + $0x10] sm:$0xff] %vm686_vm5, %v643_v62  ;;  %559 = vrot.lane.b32.xlu1 %v2458_v59, %s2125_s11 }
  0xb5   : > { %557 = vrot.lane.b32.xlu0 %v2461_v60, %s2125_s11 }
  0xb6   : > { %v916_v1 = vpop.permute.xlu1 %915 }
  0xb7   : > { %v914_v2 = vpop.permute.xlu0 %913  ;;  %962 = vst.msk [vmem:[#allocation2 + $0x8] sm:$0xff] %vm295_vm1, %v916_v1  ;;  %v2621_v1 = vld [vmem:[%s2216_s7 + $0xb1] sm:$0xff] }
  0xb8   : > { %961 = vst.msk [vmem:[#allocation2] sm:$0xff] %vm295_vm1, %v914_v2  ;;  %656 = vrot.lane.b32.xlu1 %v2470_v63, %s2127_s21  ;;  %v2624_v2 = vld [vmem:[%s2216_s7 + $0xa9] sm:$0xff] }
  0xb9   : > { %654 = vrot.lane.b32.xlu0 %v2473_v0, %s2127_s21 }
  0xba   : > { %v1012_v3 = vpop.permute.xlu1 %1011  ;;  %v707_v12 = vld [vmem:[#allocation2 + $0x18] sm:$0xff] }
  0xbb   : > { %v1010_v4 = vpop.permute.xlu0 %1009  ;;  %v706_v5 = vld [vmem:[#allocation2 + $0x10] sm:$0xff]  ;;  %1058 = vst.msk [vmem:[#allocation2 + $0x8] sm:$0xff] %vm392_vm2, %v1012_v3 }
  0xbc   : > { %1057 = vst.msk [vmem:[#allocation2] sm:$0xff] %vm392_vm2, %v1010_v4  ;;  %v1939_v13 = vpack.c.bf16 %v707_v12, %v706_v5  ;;  %927 = vrot.lane.b32.xlu1 %v2379_v33, %s2123_s9  ;;  %v2634_v5 = vld [vmem:[%s2216_s7 + $0xb2] sm:$0xff]  ;;  %v2637_v12 = vld [vmem:[%s2216_s7 + $0xaa] sm:$0xff] }
  0xbd   : > { %868 = vst.msk [vmem:[#allocation2 + $0x18] sm:$0xff] %vm198_vm0, %v2233_v6  ;;  %867 = vst.msk [vmem:[#allocation2 + $0x10] sm:$0xff] %vm198_vm0, %v2238_v7  ;;  %925 = vrot.lane.b32.xlu0 %v2382_v34, %s2123_s9 }
  0xbe   : > { %1941 = vmatpush3.bf16.xpose.msk.msra.mxu0 %vm2428_vm7, %v1939_v13  ;;  %v1111_v14 = vpop.permute.xlu1 %1110 }
  0xbf   : > { %v1109_v15 = vpop.permute.xlu0 %1108  ;;  %1942 = vmatprep.subr.bf16.mxu0 %v2126_v18  ;;  %1157 = vst.msk [vmem:[#allocation2 + $0x8] sm:$0xff] %vm492_vm3, %v1111_v14 }
  0xc0   : > { %1156 = vst.msk [vmem:[#allocation2] sm:$0xff] %vm492_vm3, %v1109_v15  ;;  %1023 = vrot.lane.b32.xlu1 %v2389_v35, %s2122_s8 }
  0xc1   : > { %1021 = vrot.lane.b32.xlu0 %v2392_v36, %s2122_s8  ;;  %v2539_v36 = vld [vmem:[%s2216_s7 + $0x99] sm:$0xff] }
  0xc2   : > { %v258_v6 = vpop.permute.xlu1 %257 }
  0xc3   : > { %v256_v7 = vpop.permute.xlu0 %255  ;;  %301 = vst.msk [vmem:[#allocation2 + $0x28] sm:$0xff] %vm295_vm1, %v258_v6 }
  0xc4   : > { %300 = vst.msk [vmem:[#allocation2 + $0x20] sm:$0xff] %vm295_vm1, %v256_v7  ;;  %1122 = vrot.lane.b32.xlu1 %v2285_v19, %s2124_s10 }
  0xc5   : > { %1120 = vrot.lane.b32.xlu0 %v2288_v20, %s2124_s10 }
  0xc6   : > { %v1207_v16 = vpop.permute.xlu1 %1206 }
  0xc7   : > { %v1205_v17 = vpop.permute.xlu0 %1204  ;;  %1253 = vst.msk [vmem:[#allocation2 + $0x8] sm:$0xff] %vm589_vm4, %v1207_v16 }
  0xc8   : > { %1252 = vst.msk [vmem:[#allocation2] sm:$0xff] %vm589_vm4, %v1205_v17  ;;  %269 = vrot.lane.b32.xlu1 %v2458_v59, %s2123_s9 }
  0xc9   : > { %267 = vrot.lane.b32.xlu0 %v2461_v60, %s2123_s9 }
  0xca   : > { %v355_v21 = vpop.permute.xlu1 %354 }
  0xcb   : > { %v353_v22 = vpop.permute.xlu0 %352  ;;  %398 = vst.msk [vmem:[#allocation2 + $0x28] sm:$0xff] %vm392_vm2, %v355_v21 }
  0xcc   : > { %397 = vst.msk [vmem:[#allocation2 + $0x20] sm:$0xff] %vm392_vm2, %v353_v22  ;;  %1218 = vrot.lane.b32.xlu1 %v2458_v59, %s2125_s11 }
  0xcd   : > { %1216 = vrot.lane.b32.xlu0 %v2461_v60, %s2125_s11 }
  0xce   : > { %v1303_v23 = vpop.permute.xlu1 %1302 }
  0xcf   : > { %v1301_v24 = vpop.permute.xlu0 %1300  ;;  %1349 = vst.msk [vmem:[#allocation2 + $0x8] sm:$0xff] %vm686_vm5, %v1303_v23 }
  0xd0   : > { %1348 = vst.msk [vmem:[#allocation2] sm:$0xff] %vm686_vm5, %v1301_v24  ;;  %366 = vrot.lane.b32.xlu1 %v2470_v63, %s2122_s8 }
  0xd1   : > { %364 = vrot.lane.b32.xlu0 %v2473_v0, %s2122_s8 }
  0xd2   : > { %v455_v27 = vpop.permute.xlu1 %454 }
  0xd3   : > { %v453_v28 = vpop.permute.xlu0 %452  ;;  %498 = vst.msk [vmem:[#allocation2 + $0x28] sm:$0xff] %vm492_vm3, %v455_v27 }
  0xd4   : > { %497 = vst.msk [vmem:[#allocation2 + $0x20] sm:$0xff] %vm492_vm3, %v453_v28  ;;  %1314 = vrot.lane.b32.xlu1 %v2470_v63, %s2127_s21 }
  0xd5   : > { %1312 = vrot.lane.b32.xlu0 %v2473_v0, %s2127_s21 }
  0xd6   : > { %v552_v29 = vpop.permute.xlu1 %551  ;;  %v1367_v34 = vld [vmem:[#allocation2 + $0x8] sm:$0xff] }
  0xd7   : > { %v550_v30 = vpop.permute.xlu0 %549  ;;  %v1366_v33 = vld [vmem:[#allocation2] sm:$0xff]  ;;  %595 = vst.msk [vmem:[#allocation2 + $0x28] sm:$0xff] %vm589_vm4, %v552_v29 }
  0xd8   : > { %594 = vst.msk [vmem:[#allocation2 + $0x20] sm:$0xff] %vm589_vm4, %v550_v30  ;;  %v1967_v35 = vpack.c.bf16 %v1367_v34, %v1366_v33  ;;  %466 = vrot.lane.b32.xlu1 %v2323_v25, %s2124_s10 }
  0xd9   : > { %464 = vrot.lane.b32.xlu0 %v2326_v26, %s2124_s10 }
  0xda   : > { %1969 = vmatpush3.bf16.xpose.msk.msra.mxu1 %vm2428_vm7, %v1967_v35  ;;  %v649_v38 = vpop.permute.xlu1 %648  ;;  %v2695_v35 = vld [vmem:[%s2216_s7 + $0xc8] sm:$0xff] }
  0xdb   : > { %v647_v39 = vpop.permute.xlu0 %646  ;;  %1970 = vmatprep.subr.bf16.mxu1 %v2126_v18  ;;  %692 = vst.msk [vmem:[#allocation2 + $0x28] sm:$0xff] %vm686_vm5, %v649_v38 }
  0xdc   : > { %691 = vst.msk [vmem:[#allocation2 + $0x20] sm:$0xff] %vm686_vm5, %v647_v39  ;;  %563 = vrot.lane.b32.xlu1 %v2539_v36, %s2125_s11 }
  0xdd   : > { %561 = vrot.lane.b32.xlu0 %v2542_v37, %s2125_s11 }
  0xde   : > { %v920_v42 = vpop.permute.xlu1 %919 }
  0xdf   : > { %v918_v43 = vpop.permute.xlu0 %917  ;;  %964 = vst.msk [vmem:[#allocation2 + $0x18] sm:$0xff] %vm295_vm1, %v920_v42  ;;  %v1674_v42 = vld [vmem:[%s2216_s7 + $0xc9] sm:$0xff] }
  0xe0   : > { %963 = vst.msk [vmem:[#allocation2 + $0x10] sm:$0xff] %vm295_vm1, %v918_v43  ;;  %660 = vrot.lane.b32.xlu1 %v2552_v40, %s2127_s21  ;;  %v1673_v43 = vld [vmem:[%s2216_s7 + $0xc1] sm:$0xff] }
  0xe1   : > { %658 = vrot.lane.b32.xlu0 %v2555_v41, %s2127_s21 }
  0xe2   : > { %v1016_v44 = vpop.permute.xlu1 %1015  ;;  %v709_v47 = vld [vmem:[#allocation2 + $0x28] sm:$0xff] }
  0xe3   : > { %v1014_v45 = vpop.permute.xlu0 %1013  ;;  %v708_v46 = vld [vmem:[#allocation2 + $0x20] sm:$0xff]  ;;  %1060 = vst.msk [vmem:[#allocation2 + $0x18] sm:$0xff] %vm392_vm2, %v1016_v44 }
  0xe4   : > { %1059 = vst.msk [vmem:[#allocation2 + $0x10] sm:$0xff] %vm392_vm2, %v1014_v45  ;;  %v1943_v48 = vpack.c.bf16 %v709_v47, %v708_v46  ;;  %931 = vrot.lane.b32.xlu1 %v2458_v59, %s2123_s9  ;;  %v1690_v46 = vld [vmem:[%s2216_s7 + $0xca] sm:$0xff]  ;;  %v1689_v47 = vld [vmem:[%s2216_s7 + $0xc2] sm:$0xff] }
  0xe5   : > { %870 = vst.msk [vmem:[#allocation2 + $0x28] sm:$0xff] %vm198_vm0, %v2247_v8  ;;  %869 = vst.msk [vmem:[#allocation2 + $0x20] sm:$0xff] %vm198_vm0, %v2250_v9  ;;  %929 = vrot.lane.b32.xlu0 %v2461_v60, %s2123_s9 }
  0xe6   : > { %1945 = vmatpush3.bf16.xpose.msk.msra.mxu0 %vm2428_vm7, %v1943_v48  ;;  %v1115_v49 = vpop.permute.xlu1 %1114 }
  0xe7   : > { %v1113_v50 = vpop.permute.xlu0 %1112  ;;  %1946 = vmatprep.subr.bf16.mxu0 %v2126_v18  ;;  %1159 = vst.msk [vmem:[#allocation2 + $0x18] sm:$0xff] %vm492_vm3, %v1115_v49 }
  0xe8   : > { %1158 = vst.msk [vmem:[#allocation2 + $0x10] sm:$0xff] %vm492_vm3, %v1113_v50  ;;  %1027 = vrot.lane.b32.xlu1 %v2470_v63, %s2122_s8 }
  0xe9   : > { %1025 = vrot.lane.b32.xlu0 %v2473_v0, %s2122_s8 }
  0xea   : > { %v262_v8 = vpop.permute.xlu1 %261 }
  0xeb   : > { %v260_v9 = vpop.permute.xlu0 %259  ;;  %303 = vst.msk [vmem:[#allocation2 + $0x38] sm:$0xff] %vm295_vm1, %v262_v8 }
  0xec   : > { %302 = vst.msk [vmem:[#allocation2 + $0x30] sm:$0xff] %vm295_vm1, %v260_v9  ;;  %1126 = vrot.lane.b32.xlu1 %v2323_v25, %s2124_s10 }
  0xed   : > { %1124 = vrot.lane.b32.xlu0 %v2326_v26, %s2124_s10 }
  0xee   : > { %v1211_v51 = vpop.permute.xlu1 %1210 }
  0xef   : > { %v1209_v52 = vpop.permute.xlu0 %1208  ;;  %1255 = vst.msk [vmem:[#allocation2 + $0x18] sm:$0xff] %vm589_vm4, %v1211_v51 }
  0xf0   : > { %1254 = vst.msk [vmem:[#allocation2 + $0x10] sm:$0xff] %vm589_vm4, %v1209_v52  ;;  %273 = vrot.lane.b32.xlu1 %v2539_v36, %s2123_s9 }
  0xf1   : > { %271 = vrot.lane.b32.xlu0 %v2542_v37, %s2123_s9 }
  0xf2   : > { %v359_v54 = vpop.permute.xlu1 %358 }
  0xf3   : > { %v357_v55 = vpop.permute.xlu0 %356  ;;  %400 = vst.msk [vmem:[#allocation2 + $0x38] sm:$0xff] %vm392_vm2, %v359_v54 }
  0xf4   : > { %399 = vst.msk [vmem:[#allocation2 + $0x30] sm:$0xff] %vm392_vm2, %v357_v55  ;;  %1222 = vrot.lane.b32.xlu1 %v2539_v36, %s2125_s11 }
  0xf5   : > { %1220 = vrot.lane.b32.xlu0 %v2542_v37, %s2125_s11 }
  0xf6   : > { %v1307_v56 = vpop.permute.xlu1 %1306 }
  0xf7   : > { %v1305_v57 = vpop.permute.xlu0 %1304  ;;  %1351 = vst.msk [vmem:[#allocation2 + $0x18] sm:$0xff] %vm686_vm5, %v1307_v56 }
  0xf8   : > { %1350 = vst.msk [vmem:[#allocation2 + $0x10] sm:$0xff] %vm686_vm5, %v1305_v57  ;;  %370 = vrot.lane.b32.xlu1 %v2552_v40, %s2122_s8 }
  0xf9   : > { %368 = vrot.lane.b32.xlu0 %v2555_v41, %s2122_s8 }
  0xfa   : > { %v459_v58 = vpop.permute.xlu1 %458 }
  0xfb   : > { %v457_v59 = vpop.permute.xlu0 %456  ;;  %500 = vst.msk [vmem:[#allocation2 + $0x38] sm:$0xff] %vm492_vm3, %v459_v58 }
  0xfc   : > { %499 = vst.msk [vmem:[#allocation2 + $0x30] sm:$0xff] %vm492_vm3, %v457_v59  ;;  %1318 = vrot.lane.b32.xlu1 %v2552_v40, %s2127_s21 }
  0xfd   : > { %1316 = vrot.lane.b32.xlu0 %v2555_v41, %s2127_s21 }
  0xfe   : > { %v556_v60 = vpop.permute.xlu1 %555  ;;  %v1369_v63 = vld [vmem:[#allocation2 + $0x18] sm:$0xff] }
  0xff   : > { %v554_v61 = vpop.permute.xlu0 %553  ;;  %v1368_v62 = vld [vmem:[#allocation2 + $0x10] sm:$0xff]  ;;  %597 = vst.msk [vmem:[#allocation2 + $0x38] sm:$0xff] %vm589_vm4, %v556_v60 }
 0x100   : > { %596 = vst.msk [vmem:[#allocation2 + $0x30] sm:$0xff] %vm589_vm4, %v554_v61  ;;  %v1971_v0 = vpack.c.bf16 %v1369_v63, %v1368_v62  ;;  %470 = vrot.lane.b32.xlu1 %v2361_v31, %s2124_s10 }
 0x101   : > { %468 = vrot.lane.b32.xlu0 %v2364_v32, %s2124_s10 }
 0x102   : > { %1973 = vmatpush3.bf16.xpose.msk.msra.mxu1 %vm2428_vm7, %v1971_v0  ;;  %v653_v3 = vpop.permute.xlu1 %652  ;;  %v1773_v0 = vld [vmem:[%s2216_s7 + $0xe0] sm:$0xff] }
 0x103   : > { %v651_v4 = vpop.permute.xlu0 %650  ;;  %1974 = vmatprep.subr.bf16.mxu1 %v2126_v18  ;;  %694 = vst.msk [vmem:[#allocation2 + $0x38] sm:$0xff] %vm686_vm5, %v653_v3 }
 0x104   : > { %693 = vst.msk [vmem:[#allocation2 + $0x30] sm:$0xff] %vm686_vm5, %v651_v4  ;;  %567 = vrot.lane.b32.xlu1 %v2621_v1, %s2125_s11 }
 0x105   : > { %565 = vrot.lane.b32.xlu0 %v2624_v2, %s2125_s11 }
 0x106   : > { %v924_v13 = vpop.permute.xlu1 %923 }
 0x107   : > { %v922_v14 = vpop.permute.xlu0 %921  ;;  %966 = vst.msk [vmem:[#allocation2 + $0x28] sm:$0xff] %vm295_vm1, %v924_v13  ;;  %v1789_v13 = vld [vmem:[%s2216_s7 + $0xe1] sm:$0xff] }
 0x108   : > { %965 = vst.msk [vmem:[#allocation2 + $0x20] sm:$0xff] %vm295_vm1, %v922_v14  ;;  %664 = vrot.lane.b32.xlu1 %v2634_v5, %s2127_s21  ;;  %v1788_v14 = vld [vmem:[%s2216_s7 + $0xd9] sm:$0xff] }
 0x109   : > { %662 = vrot.lane.b32.xlu0 %v2637_v12, %s2127_s21 }
 0x10a   : > { %v1020_v15 = vpop.permute.xlu1 %1019  ;;  %v711_v16 = vld [vmem:[#allocation2 + $0x38] sm:$0xff] }
 0x10b   : > { %v1018_v6 = vpop.permute.xlu0 %1017  ;;  %v710_v7 = vld [vmem:[#allocation2 + $0x30] sm:$0xff]  ;;  %1062 = vst.msk [vmem:[#allocation2 + $0x28] sm:$0xff] %vm392_vm2, %v1020_v15 }
 0x10c   : > { %1061 = vst.msk [vmem:[#allocation2 + $0x20] sm:$0xff] %vm392_vm2, %v1018_v6  ;;  %v1947_v17 = vpack.c.bf16 %v711_v16, %v710_v7  ;;  %935 = vrot.lane.b32.xlu1 %v2539_v36, %s2123_s9  ;;  %v2698_v36 = vld [vmem:[%s2216_s7 + $0xc0] sm:$0xff] }
 0x10d   : > { %872 = vst.msk [vmem:[#allocation2 + $0x38] sm:$0xff] %vm198_vm0, %v2257_v10  ;;  %871 = vst.msk [vmem:[#allocation2 + $0x30] sm:$0xff] %vm198_vm0, %v2260_v11  ;;  %933 = vrot.lane.b32.xlu0 %v2542_v37, %s2123_s9  ;;  %v1805_v7 = vld [vmem:[%s2216_s7 + $0xe2] sm:$0xff]  ;;  %v1804_v16 = vld [vmem:[%s2216_s7 + $0xda] sm:$0xff] }
 0x10e   : > { %1949 = vmatpush3.bf16.xpose.msk.msra.mxu0 %vm2428_vm7, %v1947_v17  ;;  %v1119_v21 = vpop.permute.xlu1 %1118 }
 0x10f   : > { %v1117_v22 = vpop.permute.xlu0 %1116  ;;  %1950 = vmatprep.subr.bf16.mxu0 %v2126_v18  ;;  %1161 = vst.msk [vmem:[#allocation2 + $0x28] sm:$0xff] %vm492_vm3, %v1119_v21 }
 0x110   : > { %1160 = vst.msk [vmem:[#allocation2 + $0x20] sm:$0xff] %vm492_vm3, %v1117_v22  ;;  %1031 = vrot.lane.b32.xlu1 %v2552_v40, %s2122_s8  ;;  %v2129_v22 = vmov 0.0  }
 0x111   : > { %1029 = vrot.lane.b32.xlu0 %v2555_v41, %s2122_s8  ;;  %1896 = vmatprep.mubr.msk.f32.mxu0 %vm2128_vm8, %v2129_v22 }
 0x112   : > { %v266_v10 = vpop.permute.xlu1 %265  ;;  %1931 = vmatprep.mubr.msk.f32.mxu1 %vm2128_vm8, %v2129_v22 }
 0x113   : > { %v264_v11 = vpop.permute.xlu0 %263  ;;  %305 = vst.msk [vmem:[#allocation2 + $0x48] sm:$0xff] %vm295_vm1, %v266_v10 }
 0x114   : > { %304 = vst.msk [vmem:[#allocation2 + $0x40] sm:$0xff] %vm295_vm1, %v264_v11  ;;  %1130 = vrot.lane.b32.xlu1 %v2361_v31, %s2124_s10 }
 0x115   : > { %1128 = vrot.lane.b32.xlu0 %v2364_v32, %s2124_s10 }
 0x116   : > { %v1215_v23 = vpop.permute.xlu1 %1214 }
 0x117   : > { %v1213_v24 = vpop.permute.xlu0 %1212  ;;  %1257 = vst.msk [vmem:[#allocation2 + $0x28] sm:$0xff] %vm589_vm4, %v1215_v23 }
 0x118   : > { %1256 = vst.msk [vmem:[#allocation2 + $0x20] sm:$0xff] %vm589_vm4, %v1213_v24  ;;  %277 = vrot.lane.b32.xlu1 %v2621_v1, %s2123_s9 }
 0x119   : > { %275 = vrot.lane.b32.xlu0 %v2624_v2, %s2123_s9 }
 0x11a   : > { %v363_v27 = vpop.permute.xlu1 %362 }
 0x11b   : > { %v361_v28 = vpop.permute.xlu0 %360  ;;  %402 = vst.msk [vmem:[#allocation2 + $0x48] sm:$0xff] %vm392_vm2, %v363_v27 }
 0x11c   : > { %401 = vst.msk [vmem:[#allocation2 + $0x40] sm:$0xff] %vm392_vm2, %v361_v28  ;;  %1226 = vrot.lane.b32.xlu1 %v2621_v1, %s2125_s11  ;;  %v1382_v28 = vld [vmem:[%s2914_s2] sm:$0xff] }
 0x11d   : > { %1224 = vrot.lane.b32.xlu0 %v2624_v2, %s2125_s11 }
 0x11e   : > { %v1311_v29 = vpop.permute.xlu1 %1310 }
 0x11f   : > { %v1309_v30 = vpop.permute.xlu0 %1308  ;;  %1353 = vst.msk [vmem:[#allocation2 + $0x28] sm:$0xff] %vm686_vm5, %v1311_v29  ;;  %v2130_v29 = vmov 0  }
 0x120   : > { %1352 = vst.msk [vmem:[#allocation2 + $0x20] sm:$0xff] %vm686_vm5, %v1309_v30  ;;  %374 = vrot.lane.b32.xlu1 %v2634_v5, %s2122_s8  ;;  %2064 = vset.pattern.permute.xlu0 %v2130_v29 }
 0x121   : > { %372 = vrot.lane.b32.xlu0 %v2637_v12, %s2122_s8  ;;  %2065 = vset.pattern.permute.xlu1 %v2130_v29 }
 0x122   : > { %v463_v33 = vpop.permute.xlu1 %462 }
 0x123   : > { %v461_v34 = vpop.permute.xlu0 %460  ;;  %502 = vst.msk [vmem:[#allocation2 + $0x48] sm:$0xff] %vm492_vm3, %v463_v33 }
 0x124   : > { %501 = vst.msk [vmem:[#allocation2 + $0x40] sm:$0xff] %vm492_vm3, %v461_v34  ;;  %1322 = vrot.lane.b32.xlu1 %v2634_v5, %s2127_s21 }
 0x125   : > { %1320 = vrot.lane.b32.xlu0 %v2637_v12, %s2127_s21 }
 0x126   : > { %v560_v37 = vpop.permute.xlu1 %559  ;;  %v1371_v40 = vld [vmem:[#allocation2 + $0x28] sm:$0xff] }
 0x127   : > { %v558_v38 = vpop.permute.xlu0 %557  ;;  %v1370_v39 = vld [vmem:[#allocation2 + $0x20] sm:$0xff]  ;;  %599 = vst.msk [vmem:[#allocation2 + $0x48] sm:$0xff] %vm589_vm4, %v560_v37 }
 0x128   : > { %598 = vst.msk [vmem:[#allocation2 + $0x40] sm:$0xff] %vm589_vm4, %v558_v38  ;;  %v1975_v41 = vpack.c.bf16 %v1371_v40, %v1370_v39  ;;  %474 = vrot.lane.b32.xlu1 %v2695_v35, %s2124_s10 }
 0x129   : > { %472 = vrot.lane.b32.xlu0 %v2698_v36, %s2124_s10 }
 0x12a   : > { %1977 = vmatpush3.bf16.xpose.msk.msra.mxu1 %vm2428_vm7, %v1975_v41  ;;  %v657_v44 = vpop.permute.xlu1 %656 }
 0x12b   : > { %v655_v45 = vpop.permute.xlu0 %654  ;;  %1978 = vmatprep.subr.bf16.mxu1 %v2126_v18  ;;  %696 = vst.msk [vmem:[#allocation2 + $0x48] sm:$0xff] %vm686_vm5, %v657_v44 }
 0x12c   : > { %695 = vst.msk [vmem:[#allocation2 + $0x40] sm:$0xff] %vm686_vm5, %v655_v45  ;;  %571 = vrot.lane.b32.xlu1 %v1674_v42, %s2125_s11 }
 0x12d   : > { %569 = vrot.lane.b32.xlu0 %v1673_v43, %s2125_s11 }
 0x12e   : > { %v928_v48 = vpop.permute.xlu1 %927 }
 0x12f   : > { %v926_v49 = vpop.permute.xlu0 %925  ;;  %968 = vst.msk [vmem:[#allocation2 + $0x38] sm:$0xff] %vm295_vm1, %v928_v48 }
 0x130   : > { %967 = vst.msk [vmem:[#allocation2 + $0x30] sm:$0xff] %vm295_vm1, %v926_v49  ;;  %668 = vrot.lane.b32.xlu1 %v1690_v46, %s2127_s21 }
 0x131   : > { %666 = vrot.lane.b32.xlu0 %v1689_v47, %s2127_s21 }
 0x132   : > { %v1024_v50 = vpop.permute.xlu1 %1023  ;;  %v713_v51 = vld [vmem:[#allocation2 + $0x48] sm:$0xff] }
 0x133   : > { %v1022_v8 = vpop.permute.xlu0 %1021  ;;  %v712_v9 = vld [vmem:[#allocation2 + $0x40] sm:$0xff]  ;;  %1064 = vst.msk [vmem:[#allocation2 + $0x38] sm:$0xff] %vm392_vm2, %v1024_v50 }
 0x134   : > { %1063 = vst.msk [vmem:[#allocation2 + $0x30] sm:$0xff] %vm392_vm2, %v1022_v8  ;;  %v1951_v52 = vpack.c.bf16 %v713_v51, %v712_v9  ;;  %939 = vrot.lane.b32.xlu1 %v2621_v1, %s2123_s9  ;;  %v1772_v1 = vld [vmem:[%s2216_s7 + $0xd8] sm:$0xff]  ;;  %s1519_s7 = sadd.s32 (%p2197_p5), %s2104_s14, %s1826_s6 }
 0x135   : > { %874 = vst.msk [vmem:[#allocation2 + $0x48] sm:$0xff] %vm198_vm0, %v2285_v19  ;;  %873 = vst.msk [vmem:[#allocation2 + $0x40] sm:$0xff] %vm198_vm0, %v2288_v20  ;;  %937 = vrot.lane.b32.xlu0 %v2624_v2, %s2123_s9  ;;  %s1827_s12 = sshll.u32 (%p2197_p5), %s1519_s7, 3 }
 0x136   : > { %1953 = vmatpush3.bf16.xpose.msk.msra.mxu0 %vm2428_vm7, %v1951_v52  ;;  %v1123_v54 = vpop.permute.xlu1 %1122 }
 0x137   : > { %v1121_v55 = vpop.permute.xlu0 %1120  ;;  %1954 = vmatprep.subr.bf16.mxu0 %v2126_v18  ;;  %1163 = vst.msk [vmem:[#allocation2 + $0x38] sm:$0xff] %vm492_vm3, %v1123_v54 }
 0x138   : > { %1162 = vst.msk [vmem:[#allocation2 + $0x30] sm:$0xff] %vm492_vm3, %v1121_v55  ;;  %1035 = vrot.lane.b32.xlu1 %v2634_v5, %s2122_s8 }
 0x139   : > { %1033 = vrot.lane.b32.xlu0 %v2637_v12, %s2122_s8 }
 0x13a   : > { %v270_v19 = vpop.permute.xlu1 %269 }
 0x13b   : > { %v268_v20 = vpop.permute.xlu0 %267  ;;  %307 = vst.msk [vmem:[#allocation2 + $0x58] sm:$0xff] %vm295_vm1, %v270_v19 }
 0x13c   : > { %306 = vst.msk [vmem:[#allocation2 + $0x50] sm:$0xff] %vm295_vm1, %v268_v20  ;;  %1134 = vrot.lane.b32.xlu1 %v2695_v35, %s2124_s10 }
 0x13d   : > { %1132 = vrot.lane.b32.xlu0 %v2698_v36, %s2124_s10 }
 0x13e   : > { %v1219_v56 = vpop.permute.xlu1 %1218 }
 0x13f   : > { %v1217_v57 = vpop.permute.xlu0 %1216  ;;  %1259 = vst.msk [vmem:[#allocation2 + $0x38] sm:$0xff] %vm589_vm4, %v1219_v56 }
 0x140   : > { %1258 = vst.msk [vmem:[#allocation2 + $0x30] sm:$0xff] %vm589_vm4, %v1217_v57  ;;  %1230 = vrot.lane.b32.xlu1 %v1674_v42, %s2125_s11 }
 0x141   : > { %1228 = vrot.lane.b32.xlu0 %v1673_v43, %s2125_s11 }
 0x142   : > { %v367_v58 = vpop.permute.xlu1 %366 }
 0x143   : > { %v365_v59 = vpop.permute.xlu0 %364  ;;  %404 = vst.msk [vmem:[#allocation2 + $0x58] sm:$0xff] %vm392_vm2, %v367_v58 }
 0x144   : > { %403 = vst.msk [vmem:[#allocation2 + $0x50] sm:$0xff] %vm392_vm2, %v365_v59  ;;  %1326 = vrot.lane.b32.xlu1 %v1690_v46, %s2127_s21 }
 0x145   : > { %1324 = vrot.lane.b32.xlu0 %v1689_v47, %s2127_s21 }
 0x146   : > { %v1315_v60 = vpop.permute.xlu1 %1314 }
 0x147   : > { %v1313_v61 = vpop.permute.xlu0 %1312  ;;  %1355 = vst.msk [vmem:[#allocation2 + $0x38] sm:$0xff] %vm686_vm5, %v1315_v60 }
 0x148   : > { %1354 = vst.msk [vmem:[#allocation2 + $0x30] sm:$0xff] %vm686_vm5, %v1313_v61  ;;  %943 = vrot.lane.b32.xlu1 %v1674_v42, %s2123_s9 }
 0x149   : > { %941 = vrot.lane.b32.xlu0 %v1673_v43, %s2123_s9 }
 0x14a   : > { %v467_v62 = vpop.permute.xlu1 %466 }
 0x14b   : > { %v465_v63 = vpop.permute.xlu0 %464  ;;  %504 = vst.msk [vmem:[#allocation2 + $0x58] sm:$0xff] %vm492_vm3, %v467_v62 }
 0x14c   : > { %503 = vst.msk [vmem:[#allocation2 + $0x50] sm:$0xff] %vm492_vm3, %v465_v63  ;;  %1039 = vrot.lane.b32.xlu1 %v1690_v46, %s2122_s8 }
 0x14d   : > { %1037 = vrot.lane.b32.xlu0 %v1689_v47, %s2122_s8 }
 0x14e   : > { %v564_v2 = vpop.permute.xlu1 %563  ;;  %v1373_v5 = vld [vmem:[#allocation2 + $0x38] sm:$0xff] }
 0x14f   : > { %v562_v3 = vpop.permute.xlu0 %561  ;;  %v1372_v4 = vld [vmem:[#allocation2 + $0x30] sm:$0xff]  ;;  %601 = vst.msk [vmem:[#allocation2 + $0x58] sm:$0xff] %vm589_vm4, %v564_v2 }
 0x150   : > { %600 = vst.msk [vmem:[#allocation2 + $0x50] sm:$0xff] %vm589_vm4, %v562_v3  ;;  %v1979_v12 = vpack.c.bf16 %v1373_v5, %v1372_v4  ;;  %1138 = vrot.lane.b32.xlu1 %v1773_v0, %s2124_s10 }
 0x151   : > { %1136 = vrot.lane.b32.xlu0 %v1772_v1, %s2124_s10  ;;  %s1521_s10 = scalar_lea.vmem (%p2197_p5), %s2915_s3, %s1827_s12 }
 0x152   : > { %1981 = vmatpush3.bf16.xpose.msk.msra.mxu1 %vm2428_vm7, %v1979_v12  ;;  %v661_v15 = vpop.permute.xlu1 %660 }
 0x153   : > { %v659_v6 = vpop.permute.xlu0 %658  ;;  %1982 = vmatprep.subr.bf16.mxu1 %v2126_v18  ;;  %698 = vst.msk [vmem:[#allocation2 + $0x58] sm:$0xff] %vm686_vm5, %v661_v15 }
 0x154   : > { %697 = vst.msk [vmem:[#allocation2 + $0x50] sm:$0xff] %vm686_vm5, %v659_v6  ;;  %1234 = vrot.lane.b32.xlu1 %v1789_v13, %s2125_s11 }
 0x155   : > { %1232 = vrot.lane.b32.xlu0 %v1788_v14, %s2125_s11 }
 0x156   : > { %v932_v17 = vpop.permute.xlu1 %931 }
 0x157   : > { %v930_v21 = vpop.permute.xlu0 %929  ;;  %970 = vst.msk [vmem:[#allocation2 + $0x48] sm:$0xff] %vm295_vm1, %v932_v17 }
 0x158   : > { %969 = vst.msk [vmem:[#allocation2 + $0x40] sm:$0xff] %vm295_vm1, %v930_v21  ;;  %1330 = vrot.lane.b32.xlu1 %v1805_v7, %s2127_s21 }
 0x159   : > { %1328 = vrot.lane.b32.xlu0 %v1804_v16, %s2127_s21 }
 0x15a   : > { %v1028_v10 = vpop.permute.xlu1 %1027  ;;  %v715_v24 = vld [vmem:[#allocation2 + $0x58] sm:$0xff] }
 0x15b   : > { %v1026_v11 = vpop.permute.xlu0 %1025  ;;  %v714_v23 = vld [vmem:[#allocation2 + $0x50] sm:$0xff]  ;;  %1066 = vst.msk [vmem:[#allocation2 + $0x48] sm:$0xff] %vm392_vm2, %v1028_v10 }
 0x15c   : > { %1065 = vst.msk [vmem:[#allocation2 + $0x40] sm:$0xff] %vm392_vm2, %v1026_v11  ;;  %v1955_v27 = vpack.c.bf16 %v715_v24, %v714_v23  ;;  %1385 = vperm.xlu1 %2065, %v1382_v28   ;;  %v703_v11 = vld [vmem:[%s2913_s1] sm:$0xff] }
 0x15d   : > { %876 = vst.msk [vmem:[#allocation2 + $0x58] sm:$0xff] %vm198_vm0, %v2323_v25  ;;  %875 = vst.msk [vmem:[#allocation2 + $0x50] sm:$0xff] %vm198_vm0, %v2326_v26  ;;  %723 = vperm.xlu0 %2064, %v1382_v28  }
 0x15e   : > { %1957 = vmatpush3.bf16.xpose.msk.msra.mxu0 %vm2428_vm7, %v1955_v27  ;;  %v1127_v30 = vpop.permute.xlu1 %1126 }
 0x15f   : > { %v1125_v33 = vpop.permute.xlu0 %1124  ;;  %1958 = vmatprep.subr.bf16.mxu0 %v2126_v18  ;;  %1165 = vst.msk [vmem:[#allocation2 + $0x48] sm:$0xff] %vm492_vm3, %v1127_v30 }
 0x160   : > { %1164 = vst.msk [vmem:[#allocation2 + $0x40] sm:$0xff] %vm492_vm3, %v1125_v33 }
 0x162   : > { %v274_v25 = vpop.permute.xlu1 %273 }
 0x163   : > { %v272_v26 = vpop.permute.xlu0 %271  ;;  %309 = vst.msk [vmem:[#allocation2 + $0x68] sm:$0xff] %vm295_vm1, %v274_v25 }
 0x164   : > { %308 = vst.msk [vmem:[#allocation2 + $0x60] sm:$0xff] %vm295_vm1, %v272_v26 }
 0x166   : > { %v1223_v34 = vpop.permute.xlu1 %1222 }
 0x167   : > { %v1221_v37 = vpop.permute.xlu0 %1220  ;;  %1261 = vst.msk [vmem:[#allocation2 + $0x48] sm:$0xff] %vm589_vm4, %v1223_v34 }
 0x168   : > { %1260 = vst.msk [vmem:[#allocation2 + $0x40] sm:$0xff] %vm589_vm4, %v1221_v37 }
 0x16a   : > { %v371_v38 = vpop.permute.xlu1 %370 }
 0x16b   : > { %v369_v39 = vpop.permute.xlu0 %368  ;;  %406 = vst.msk [vmem:[#allocation2 + $0x68] sm:$0xff] %vm392_vm2, %v371_v38 }
 0x16c   : > { %405 = vst.msk [vmem:[#allocation2 + $0x60] sm:$0xff] %vm392_vm2, %v369_v39 }
 0x16e   : > { %v1319_v40 = vpop.permute.xlu1 %1318 }
 0x16f   : > { %v1317_v41 = vpop.permute.xlu0 %1316  ;;  %1357 = vst.msk [vmem:[#allocation2 + $0x48] sm:$0xff] %vm686_vm5, %v1319_v40 }
 0x170   : > { %1356 = vst.msk [vmem:[#allocation2 + $0x40] sm:$0xff] %vm686_vm5, %v1317_v41 }
 0x172   : > { %v471_v42 = vpop.permute.xlu1 %470 }
 0x173   : > { %v469_v43 = vpop.permute.xlu0 %468  ;;  %506 = vst.msk [vmem:[#allocation2 + $0x68] sm:$0xff] %vm492_vm3, %v471_v42 }
 0x174   : > { %505 = vst.msk [vmem:[#allocation2 + $0x60] sm:$0xff] %vm492_vm3, %v469_v43 }
 0x176   : > { %v568_v44 = vpop.permute.xlu1 %567  ;;  %v1375_v47 = vld [vmem:[#allocation2 + $0x48] sm:$0xff] }
 0x177   : > { %v566_v45 = vpop.permute.xlu0 %565  ;;  %v1374_v46 = vld [vmem:[#allocation2 + $0x40] sm:$0xff]  ;;  %603 = vst.msk [vmem:[#allocation2 + $0x68] sm:$0xff] %vm589_vm4, %v568_v44  ;;  %v1806_v44 = vld [vmem:[%s2913_s1 + $0x8] sm:$0xff] }
 0x178   : > { %602 = vst.msk [vmem:[#allocation2 + $0x60] sm:$0xff] %vm589_vm4, %v566_v45  ;;  %v1983_v48 = vpack.c.bf16 %v1375_v47, %v1374_v46 }
 0x17a   : > { %1985 = vmatpush3.bf16.xpose.msk.msra.mxu1 %vm2428_vm7, %v1983_v48  ;;  %v665_v49 = vpop.permute.xlu1 %664 }
 0x17b   : > { %v663_v50 = vpop.permute.xlu0 %662  ;;  %1986 = vmatprep.subr.bf16.mxu1 %v2126_v18  ;;  %700 = vst.msk [vmem:[#allocation2 + $0x68] sm:$0xff] %vm686_vm5, %v665_v49 }
 0x17c   : > { %699 = vst.msk [vmem:[#allocation2 + $0x60] sm:$0xff] %vm686_vm5, %v663_v50 }
 0x17e   : > { %v936_v8 = vpop.permute.xlu1 %935 }
 0x17f   : > { %v934_v9 = vpop.permute.xlu0 %933  ;;  %972 = vst.msk [vmem:[#allocation2 + $0x58] sm:$0xff] %vm295_vm1, %v936_v8 }
 0x180   : > { %971 = vst.msk [vmem:[#allocation2 + $0x50] sm:$0xff] %vm295_vm1, %v934_v9 }
 0x182   : > { %v1032_v51 = vpop.permute.xlu1 %1031  ;;  %v717_v55 = vld [vmem:[#allocation2 + $0x68] sm:$0xff] }
 0x183   : > { %v1030_v52 = vpop.permute.xlu0 %1029  ;;  %v716_v54 = vld [vmem:[#allocation2 + $0x60] sm:$0xff]  ;;  %1068 = vst.msk [vmem:[#allocation2 + $0x58] sm:$0xff] %vm392_vm2, %v1032_v51 }
 0x184   : > { %1067 = vst.msk [vmem:[#allocation2 + $0x50] sm:$0xff] %vm392_vm2, %v1030_v52  ;;  %v1959_v19 = vpack.c.bf16 %v717_v55, %v716_v54 }
 0x185   : > { %878 = vst.msk [vmem:[#allocation2 + $0x68] sm:$0xff] %vm198_vm0, %v2361_v31  ;;  %877 = vst.msk [vmem:[#allocation2 + $0x60] sm:$0xff] %vm198_vm0, %v2364_v32 }
 0x186   : > { %1961 = vmatpush3.bf16.xpose.msk.msra.mxu0 %vm2428_vm7, %v1959_v19  ;;  %v1131_v20 = vpop.permute.xlu1 %1130 }
 0x187   : > { %v1129_v56 = vpop.permute.xlu0 %1128  ;;  %1962 = vmatprep.subr.bf16.mxu0 %v2126_v18  ;;  %1167 = vst.msk [vmem:[#allocation2 + $0x58] sm:$0xff] %vm492_vm3, %v1131_v20 }
 0x188   : > { %1166 = vst.msk [vmem:[#allocation2 + $0x50] sm:$0xff] %vm492_vm3, %v1129_v56 }
 0x18a   : > { %v278_v57 = vpop.permute.xlu1 %277 }
 0x18b   : > { %v276_v58 = vpop.permute.xlu0 %275  ;;  %311 = vst.msk [vmem:[#allocation2 + $0x78] sm:$0xff] %vm295_vm1, %v278_v57 }
 0x18c   : > { %310 = vst.msk [vmem:[#allocation2 + $0x70] sm:$0xff] %vm295_vm1, %v276_v58 }
 0x18e   : > { %v1227_v31 = vpop.permute.xlu1 %1226 }
 0x18f   : > { %v1225_v59 = vpop.permute.xlu0 %1224  ;;  %1263 = vst.msk [vmem:[#allocation2 + $0x58] sm:$0xff] %vm589_vm4, %v1227_v31 }
 0x190   : > { %1262 = vst.msk [vmem:[#allocation2 + $0x50] sm:$0xff] %vm589_vm4, %v1225_v59 }
 0x192   : > { %v375_v32 = vpop.permute.xlu1 %374 }
 0x193   : > { %v373_v60 = vpop.permute.xlu0 %372  ;;  %408 = vst.msk [vmem:[#allocation2 + $0x78] sm:$0xff] %vm392_vm2, %v375_v32 }
 0x194   : > { %407 = vst.msk [vmem:[#allocation2 + $0x70] sm:$0xff] %vm392_vm2, %v373_v60 }
 0x196   : > { %v1323_v61 = vpop.permute.xlu1 %1322 }
 0x197   : > { %v1321_v62 = vpop.permute.xlu0 %1320  ;;  %1359 = vst.msk [vmem:[#allocation2 + $0x58] sm:$0xff] %vm686_vm5, %v1323_v61 }
 0x198   : > { %1358 = vst.msk [vmem:[#allocation2 + $0x50] sm:$0xff] %vm686_vm5, %v1321_v62 }
 0x19a   : > { %v475_v63 = vpop.permute.xlu1 %474 }
 0x19b   : > { %v473_v0 = vpop.permute.xlu0 %472  ;;  %508 = vst.msk [vmem:[#allocation2 + $0x78] sm:$0xff] %vm492_vm3, %v475_v63 }
 0x19c   : > { %507 = vst.msk [vmem:[#allocation2 + $0x70] sm:$0xff] %vm492_vm3, %v473_v0 }
 0x19e   : > { %v572_v1 = vpop.permute.xlu1 %571  ;;  %v1377_v4 = vld [vmem:[#allocation2 + $0x58] sm:$0xff] }
 0x19f   : > { %v570_v2 = vpop.permute.xlu0 %569  ;;  %v1376_v3 = vld [vmem:[#allocation2 + $0x50] sm:$0xff]  ;;  %605 = vst.msk [vmem:[#allocation2 + $0x78] sm:$0xff] %vm589_vm4, %v572_v1 }
 0x1a0   : > { %604 = vst.msk [vmem:[#allocation2 + $0x70] sm:$0xff] %vm589_vm4, %v570_v2  ;;  %v1987_v5 = vpack.c.bf16 %v1377_v4, %v1376_v3 }
 0x1a2   : > { %1989 = vmatpush3.bf16.xpose.msk.msra.mxu1 %vm2428_vm7, %v1987_v5  ;;  %v669_v12 = vpop.permute.xlu1 %668 }
 0x1a3   : > { %v667_v13 = vpop.permute.xlu0 %666  ;;  %1990 = vmatprep.subr.bf16.mxu1 %v2126_v18  ;;  %702 = vst.msk [vmem:[#allocation2 + $0x78] sm:$0xff] %vm686_vm5, %v669_v12 }
 0x1a4   : > { %701 = vst.msk [vmem:[#allocation2 + $0x70] sm:$0xff] %vm686_vm5, %v667_v13 }
 0x1a6   : > { %v940_v14 = vpop.permute.xlu1 %939 }
 0x1a7   : > { %v938_v15 = vpop.permute.xlu0 %937  ;;  %974 = vst.msk [vmem:[#allocation2 + $0x68] sm:$0xff] %vm295_vm1, %v940_v14 }
 0x1a8   : > { %973 = vst.msk [vmem:[#allocation2 + $0x60] sm:$0xff] %vm295_vm1, %v938_v15 }
 0x1aa   : > { %v1036_v6 = vpop.permute.xlu1 %1035  ;;  %v719_v17 = vld [vmem:[#allocation2 + $0x78] sm:$0xff] }
 0x1ab   : > { %v1034_v7 = vpop.permute.xlu0 %1033  ;;  %v718_v16 = vld [vmem:[#allocation2 + $0x70] sm:$0xff]  ;;  %1070 = vst.msk [vmem:[#allocation2 + $0x68] sm:$0xff] %vm392_vm2, %v1036_v6 }
 0x1ac   : > { %1069 = vst.msk [vmem:[#allocation2 + $0x60] sm:$0xff] %vm392_vm2, %v1034_v7  ;;  %v1963_v21 = vpack.c.bf16 %v719_v17, %v718_v16 }
 0x1ad   : > { %880 = vst.msk [vmem:[#allocation2 + $0x78] sm:$0xff] %vm198_vm0, %v2695_v35  ;;  %879 = vst.msk [vmem:[#allocation2 + $0x70] sm:$0xff] %vm198_vm0, %v2698_v36 }
 0x1ae   : > { %1965 = vmatpush3.bf16.xpose.msk.msra.mxu0 %vm2428_vm7, %v1963_v21  ;;  %v1135_v22 = vpop.permute.xlu1 %1134 }
 0x1af   : > { %v1133_v10 = vpop.permute.xlu0 %1132  ;;  %1169 = vst.msk [vmem:[#allocation2 + $0x68] sm:$0xff] %vm492_vm3, %v1135_v22 }
 0x1b0   : > { %1168 = vst.msk [vmem:[#allocation2 + $0x60] sm:$0xff] %vm492_vm3, %v1133_v10 }
 0x1b2   : > { %v1231_v23 = vpop.permute.xlu1 %1230 }
 0x1b3   : > { %v1229_v24 = vpop.permute.xlu0 %1228  ;;  %1265 = vst.msk [vmem:[#allocation2 + $0x68] sm:$0xff] %vm589_vm4, %v1231_v23 }
 0x1b4   : > { %1264 = vst.msk [vmem:[#allocation2 + $0x60] sm:$0xff] %vm589_vm4, %v1229_v24 }
 0x1b5   : > { %1897 = vmatmul.mubr.msk.f32.vlgmr.msra.gmra.mrb[0].mxu0 %vm726_vm6, %v703_v11 }
 0x1b6   : > { %v1327_v35 = vpop.permute.xlu1 %1326 }
 0x1b7   : > { %v1325_v36 = vpop.permute.xlu0 %1324  ;;  %1361 = vst.msk [vmem:[#allocation2 + $0x68] sm:$0xff] %vm686_vm5, %v1327_v35 }
 0x1b8   : > { %1360 = vst.msk [vmem:[#allocation2 + $0x60] sm:$0xff] %vm686_vm5, %v1325_v36 }
 0x1ba   : > { %v944_v27 = vpop.permute.xlu1 %943 }
 0x1bb   : > { %v942_v28 = vpop.permute.xlu0 %941  ;;  %976 = vst.msk [vmem:[#allocation2 + $0x78] sm:$0xff] %vm295_vm1, %v944_v27 }
 0x1bc   : > { %975 = vst.msk [vmem:[#allocation2 + $0x70] sm:$0xff] %vm295_vm1, %v942_v28 }
 0x1be   : > { %v1040_v29 = vpop.permute.xlu1 %1039  ;;  %v1379_v25 = vld [vmem:[#allocation2 + $0x68] sm:$0xff] }
 0x1bf   : > { %v1038_v30 = vpop.permute.xlu0 %1037  ;;  %v1378_v33 = vld [vmem:[#allocation2 + $0x60] sm:$0xff]  ;;  %1072 = vst.msk [vmem:[#allocation2 + $0x78] sm:$0xff] %vm392_vm2, %v1040_v29 }
 0x1c0   : > { %1071 = vst.msk [vmem:[#allocation2 + $0x70] sm:$0xff] %vm392_vm2, %v1038_v30  ;;  %v1991_v26 = vpack.c.bf16 %v1379_v25, %v1378_v33 }
 0x1c2   : > { %1993 = vmatpush3.bf16.xpose.msk.msra.mxu1 %vm2428_vm7, %v1991_v26  ;;  %v1139_v34 = vpop.permute.xlu1 %1138 }
 0x1c3   : > { %v1137_v37 = vpop.permute.xlu0 %1136  ;;  %1994 = vmatprep.subr.bf16.mxu1 %v2126_v18  ;;  %1171 = vst.msk [vmem:[#allocation2 + $0x78] sm:$0xff] %vm492_vm3, %v1139_v34 }
 0x1c4   : > { %1170 = vst.msk [vmem:[#allocation2 + $0x70] sm:$0xff] %vm492_vm3, %v1137_v37 }
 0x1c6   : > { %v1235_v38 = vpop.permute.xlu1 %1234 }
 0x1c7   : > { %v1233_v39 = vpop.permute.xlu0 %1232  ;;  %1267 = vst.msk [vmem:[#allocation2 + $0x78] sm:$0xff] %vm589_vm4, %v1235_v38 }
 0x1c8   : > { %1266 = vst.msk [vmem:[#allocation2 + $0x70] sm:$0xff] %vm589_vm4, %v1233_v39 }
 0x1ca   : > { %v1331_v40 = vpop.permute.xlu1 %1330 }
 0x1cb   : > { %v1329_v41 = vpop.permute.xlu0 %1328  ;;  %1363 = vst.msk [vmem:[#allocation2 + $0x78] sm:$0xff] %vm686_vm5, %v1331_v40 }
 0x1cc   : > { %1362 = vst.msk [vmem:[#allocation2 + $0x70] sm:$0xff] %vm686_vm5, %v1329_v41 }
 0x1d2   : > { %v1381_v43 = vld [vmem:[#allocation2 + $0x78] sm:$0xff] }
 0x1d3   : > { %v1380_v42 = vld [vmem:[#allocation2 + $0x70] sm:$0xff] }
 0x1d4   : > { %v1995_v18 = vpack.c.bf16 %v1381_v43, %v1380_v42 }
 0x1d6   : > { %1997 = vmatpush3.bf16.xpose.msk.msra.mxu1 %vm2428_vm7, %v1995_v18 }
 0x1db   : > { %v1386_v49 = vpop.permute.xlu1 %1385 }
 0x1dc   : > { %v724_v45 = vpop.permute.xlu0 %723 }
 0x1dd   : > { %1932 = vmatmul.mubr.msk.f32.vlgmr.msra.gmra.mrb[0].mxu1 %vm726_vm6, %v1806_v44 }
 0x288   : > { %v844_v46 = vpop.f32.mrb[0].mxu0 }
 0x289   : > { %v845_v47 = vadd.f32 %v844_v46, %v724_v45  ;;  %v1898_v48 = vpop.f32.mrb[1].mxu0 }
 0x28b   : > { %848 = vst [vmem:[%s173_s5] sm:$0xff] %v845_v47 }
 0x292   : > { %v1551_v53 = vld [vmem:[%s173_s5] sm:$0xff] (%p2197_p5) }
 0x293   : > { %1552 = vst [vmem:[%s1521_s10] sm:$0xff] (%p2197_p5), %v1551_v53 }
 0x2ad   : > { %1517 = sbr.rel (!%p2197_p5) target bundleno = 700 (0x2bc), region = 36 }
 0x2b0   : > { %v1505_v50 = vpop.f32.mrb[0].mxu1 }
 0x2b1   : > { %v1506_v8 = vadd.f32 %v1505_v50, %v1386_v49  ;;  %v1933_v9 = vpop.f32.mrb[1].mxu1 }
 0x2b3   : > { %1824 = vst [vmem:[%s173_s5 + $0x8] sm:$0xff] %v1506_v8 }
 0x2ba   : > { %v1553_v51 = vld [vmem:[%s173_s5 + $0x8] sm:$0xff] }
 0x2bb   : > { %1554 = vst [vmem:[%s1521_s10 + $0x10] sm:$0xff] %v1553_v51 }
 0x2bc PF: > { %s13_s18 = sadd.s32 1, %s2120_s18   ;;  %s2919_s12 = smov %s2100_s13 }
 0x2bd   : > { %p10_p10 = scmp.ge.s32.totalorder %s13_s18, 6   ;;  %s2920_s13 = smov %s2208_s27 }
 0x2be   : > { %s2921_s14 = smov %s2112_s16  ;;  %s2922_s15 = smov %s2116_s17 }
 0x2bf   : > { %s2923_s16 = smov %s2926_s19  ;;  %s2924_s17 = smov %s2930_s20 }
 0x2c0   :  { %12 = sbr.rel (!%p10_p10) target bundleno = 4 (0x4), region = 105 }

</bundles_post_ra>
